<compile_context>
chip_gen: v7x
topology: tpu7x:2x2x1
jax: 0.10.0
libtpu: 0.0.40
codegen_flags: <defaults>
</compile_context>

<pallas_src>
import jax
import jax.numpy as jnp
from jax.experimental import pallas as pl
from jax.experimental.pallas import tpu as pltpu


def _round_up(n, m):
    return ((n + m - 1) // m) * m


def _coupling_kernel(xt_ref, w1_ref, w2_ref, w3_ref, w4_ref, b_ref, yt_ref, ld_ref):
    """One batch tile of the coupling layer, batch on the lane axis.

    xt_ref : (D, BT)          f32   transposed input tile
    w1_ref : (2H, D)          bf16  [W1_s^T ; W1_t^T]                (shared masked input)
    w2_ref : (2*INNER, 2H)    bf16  block_diag(W2_s^T, W2_t^T)
    w3_ref : (2, H, INNER)    bf16  stacked [W3_s^T, W3_t^T]
    w4_ref : (2, D, H)        bf16  stacked [W4_s^T, W4_t^T]
    b_ref  : (2*INNER, 8)     f32   columns: b1_cat, b2_cat, b3_s, b3_t, b4_s, b4_t, mask, pad
    yt_ref : (D, BT)          f32   y^T
    ld_ref : (1, BT)          f32   logdet row
    """
    f32, bf16 = jnp.float32, jnp.bfloat16
    D = xt_ref.shape[0]
    H = w4_ref.shape[2]
    INNER = w3_ref.shape[2]
    H2 = 2 * H

    xt = xt_ref[...]                              # (D, BT) f32
    mask = b_ref[0:D, 6:7]                        # (D, 1) binary coupling mask
    inv_mask = 1.0 - mask
    masked = xt * mask

    # ---- Layer 1: both nets see the same masked input -> one fused matmul.
    #      bf16 x bf16 operands, f32 accumulation (native MXU fast path).
    h1 = jnp.dot(w1_ref[...], masked.astype(bf16),
                 preferred_element_type=f32) + b_ref[0:H2, 0:1]          # (2H, BT)
    row = jax.lax.broadcasted_iota(jnp.int32, h1.shape, 0)
    h1 = jnp.where(row < H, jnp.tanh(h1), jnp.maximum(h1, 0.0))          # tanh | relu halves

    # ---- Layer 2: block-diagonal fused matmul; sublane split at aligned 512.
    h2 = jnp.dot(w2_ref[...], h1.astype(bf16),
                 preferred_element_type=f32) + b_ref[:, 1:2]             # (2*INNER, BT)
    h2_s = jnp.tanh(h2[:INNER])
    h2_t = jnp.maximum(h2[INNER:], 0.0)

    # ---- Layer 3 (per net).
    h3_s = jnp.tanh(
        jnp.dot(w3_ref[0], h2_s.astype(bf16), preferred_element_type=f32)
        + b_ref[0:H, 2:3])                                               # (H, BT)
    h3_t = jnp.maximum(
        jnp.dot(w3_ref[1], h2_t.astype(bf16), preferred_element_type=f32)
        + b_ref[0:H, 3:4], 0.0)

    # ---- Layer 4 (per net, linear) + coupling masking.
    log_s = (jnp.dot(w4_ref[0], h3_s.astype(bf16), preferred_element_type=f32)
             + b_ref[0:D, 4:5]) * inv_mask                               # (D, BT)
    t = (jnp.dot(w4_ref[1], h3_t.astype(bf16), preferred_element_type=f32)
         + b_ref[0:D, 5:6]) * inv_mask

    yt_ref[...] = xt * jnp.exp(log_s) + t
    ld_ref[...] = jnp.sum(log_s, axis=0, keepdims=True)                  # (1, BT)


def _pack_params(mask, scale_params, translate_params):
    """Collapse 16 weight/bias arrays + mask into 5 DMA-friendly arrays (W^T form)."""
    sw1, sb1, sw2, sb2, sw3, sb3, sw4, sb4 = scale_params
    tw1, tb1, tw2, tb2, tw3, tb3, tw4, tb4 = translate_params
    D, H = sw1.shape
    INNER = sw2.shape[1]
    AUXR = 2 * INNER

    wdt = jnp.bfloat16  # weights stay bf16 end-to-end; MXU gets bf16 operands
    w1 = jnp.concatenate([sw1.T, tw1.T], axis=0).astype(wdt)              # (2H, D)
    z = jnp.zeros((INNER, H), jnp.float32)
    w2 = jnp.concatenate(
        [jnp.concatenate([sw2.T, z], axis=1),
         jnp.concatenate([z, tw2.T], axis=1)], axis=0).astype(wdt)        # (2*INNER, 2H)
    w3 = jnp.stack([sw3.T, tw3.T], axis=0).astype(wdt)                    # (2, H, INNER)
    w4 = jnp.stack([sw4.T, tw4.T], axis=0).astype(wdt)                    # (2, D, H)

    def col(v):
        v = jnp.asarray(v, jnp.float32).reshape(-1)
        return jnp.pad(v, (0, AUXR - v.shape[0]))

    aux = jnp.stack([
        col(jnp.concatenate([sb1.reshape(-1), tb1.reshape(-1)])),   # 0: b1 (scale|trans)
        col(jnp.concatenate([sb2.reshape(-1), tb2.reshape(-1)])),   # 1: b2 (scale|trans)
        col(sb3),                                                   # 2: b3 scale
        col(tb3),                                                   # 3: b3 translate
        col(sb4),                                                   # 4: b4 scale
        col(tb4),                                                   # 5: b4 translate
        col(mask),                                                  # 6: coupling mask
        jnp.zeros((AUXR,), jnp.float32),                            # 7: pad column
    ], axis=1)                                                      # (2*INNER, 8) f32
    return w1, w2, w3, w4, aux


def _choose_batch_tile(B, block_b):
    """Lane-aligned batch tile. Keep >= 2 grid steps whenever B spans more than
    one 128-lane group so the 'parallel' axis can split across v7x's 2 TCs."""
    lane_groups = pl.cdiv(B, 128)
    t = max(1, min(block_b // 128, lane_groups))
    if lane_groups > 1:
        t = min(t, max(1, lane_groups // 2))
    return 128 * t


def coupling_layer_forward(x, mask, scale_params, translate_params, *, block_b=1024):
    """Direct-mode CouplingLayer forward. x: (B, D) f32, mask: (1, D) f32."""
    B, D = x.shape
    H = scale_params[0].shape[1]
    INNER = scale_params[2].shape[1]
    w1, w2, w3, w4, aux = _pack_params(mask, scale_params, translate_params)

    bt = _choose_batch_tile(B, block_b)
    Bp = _round_up(B, bt)
    # Wrapper-side layout plumbing: put the batch on the lane axis.
    xt = jnp.pad(x.T, ((0, 0), (0, Bp - B)))                       # (D, Bp)
    grid = (Bp // bt,)

    yt, ldt = pl.pallas_call(
        _coupling_kernel,
        out_shape=(jax.ShapeDtypeStruct((D, Bp), jnp.float32),
                   jax.ShapeDtypeStruct((1, Bp), jnp.float32)),
        grid_spec=pltpu.PrefetchScalarGridSpec(
            num_scalar_prefetch=0,
            grid=grid,
            in_specs=[
                pl.BlockSpec((D, bt), lambda i: (0, i)),              # x^T: tiled over batch lanes
                pl.BlockSpec((2 * H, D), lambda i: (0, 0)),           # weights: VMEM-resident
                pl.BlockSpec((2 * INNER, 2 * H), lambda i: (0, 0)),
                pl.BlockSpec((2, H, INNER), lambda i: (0, 0, 0)),
                pl.BlockSpec((2, D, H), lambda i: (0, 0, 0)),
                pl.BlockSpec((2 * INNER, 8), lambda i: (0, 0)),       # bias columns + mask
            ],
            out_specs=(
                pl.BlockSpec((D, bt), lambda i: (0, i)),              # y^T, lane-dense stores
                pl.BlockSpec((1, bt), lambda i: (0, i)),              # logdet row, lane-dense
            ),
        ),
        compiler_params=pltpu.CompilerParams(
            dimension_semantics=("parallel",),        # megacore batch split on v7x
            vmem_limit_bytes=48 * 1024 * 1024,        # <= v7x 64 MiB physical; > v5e 16 MiB default
        ),
    )(xt, w1, w2, w3, w4, aux)
    return yt[:, :B].T, ldt[:, :B].T


def _make_net_params(key, dims):
    """dims = [D, H, 512, H, D]; returns [W1,b1,...,W4,b4]; W stored [in, out]."""
    params = []
    for i in range(len(dims) - 1):
        key, kw, kb = jax.random.split(key, 3)
        fan_in, fan_out = dims[i], dims[i + 1]
        w = jax.random.normal(kw, (fan_in, fan_out), jnp.float32) / jnp.sqrt(
            jnp.float32(fan_in))
        b = 0.01 * jax.random.normal(kb, (1, fan_out), jnp.float32)
        params.extend([w, b])
    return params


def _reference_forward(x, mask, scale_params, translate_params):
    """Pure-JAX reference using the same bf16-operand / f32-accumulate matmul
    path as the kernel (weights and activations rounded to bf16 at each dot)."""
    bf16, f32 = jnp.bfloat16, jnp.float32

    def bdot(a, w):
        return jnp.dot(a.astype(bf16), w.astype(bf16), preferred_element_type=f32)

    def mlp(h, p, act):
        w1, b1, w2, b2, w3, b3, w4, b4 = p
        h = act(bdot(h, w1) + b1)
        h = act(bdot(h, w2) + b2)
        h = act(bdot(h, w3) + b3)
        return bdot(h, w4) + b4

    relu = lambda v: jnp.maximum(v, 0.0)
    masked = x * mask
    log_s = mlp(masked, scale_params, jnp.tanh) * (1.0 - mask)
    t = mlp(masked, translate_params, relu) * (1.0 - mask)
    return x * jnp.exp(log_s) + t, jnp.sum(log_s, axis=-1, keepdims=True)


if __name__ == "__main__":
    B, D, H = 256, 16, 32        # batch, num_inputs, num_hidden (inner layer is 512)

    key = jax.random.PRNGKey(0)
    kx, ks, kt = jax.random.split(key, 3)

    x = jax.random.normal(kx, (B, D), jnp.float32)
    # Standard alternating binary coupling mask, shaped (1, D).
    mask = (jnp.arange(D, dtype=jnp.int32) % 2).astype(jnp.float32)[None, :]

    scale_params = _make_net_params(ks, [D, H, 512, H, D])
    translate_params = _make_net_params(kt, [D, H, 512, H, D])

    y, logdet = coupling_layer_forward(x, mask, scale_params, translate_params,
                                       block_b=1024)
    jax.block_until_ready(y)
    jax.block_until_ready(logdet)

    y_ref, logdet_ref = _reference_forward(x, mask, scale_params, translate_params)
    assert y.shape == (B, D) and logdet.shape == (B, 1)
    # Tolerance covers tiny divergences between the kernel's transposed MXU
    # accumulation order / Pallas tanh and XLA's, on top of shared bf16 rounding.
    assert jnp.allclose(y, y_ref, atol=1e-2, rtol=1e-2), \
        float(jnp.max(jnp.abs(y - y_ref)))
    assert jnp.allclose(logdet, logdet_ref, atol=1e-2, rtol=1e-2), \
        float(jnp.max(jnp.abs(logdet - logdet_ref)))

    print("KERNEL_OK")
</pallas_src>

<mosaic_0001>
module attributes {stable_mosaic.version = 11 : i64} {
  func.func @_coupling_kernel(%arg0: i32, %arg1: memref<16x128xf32, #tpu.memory_space<vmem>>, %arg2: memref<64x16xbf16, #tpu.memory_space<vmem>>, %arg3: memref<1024x64xbf16, #tpu.memory_space<vmem>>, %arg4: memref<2x32x512xbf16, #tpu.memory_space<vmem>>, %arg5: memref<2x16x32xbf16, #tpu.memory_space<vmem>>, %arg6: memref<1024x8xf32, #tpu.memory_space<vmem>>, %arg7: memref<16x128xf32, #tpu.memory_space<vmem>>, %arg8: memref<1x128xf32, #tpu.memory_space<vmem>>) attributes {dimension_semantics = [#tpu.dimension_semantics<parallel>], iteration_bounds = array<i64: 2>, scalar_prefetch = 0 : i64, scratch_operands = 0 : i64, tpu.core_type = #tpu.core_type<tc>, window_params = [{transform_indices = @transform_0, window_bounds = array<i64: 16, 128>}, {pipeline_mode = #tpu.pipeline_mode<synchronous>, transform_indices = @transform_1, window_bounds = array<i64: 64, 16>}, {pipeline_mode = #tpu.pipeline_mode<synchronous>, transform_indices = @transform_2, window_bounds = array<i64: 1024, 64>}, {pipeline_mode = #tpu.pipeline_mode<synchronous>, transform_indices = @transform_3, window_bounds = array<i64: 2, 32, 512>}, {pipeline_mode = #tpu.pipeline_mode<synchronous>, transform_indices = @transform_4, window_bounds = array<i64: 2, 16, 32>}, {pipeline_mode = #tpu.pipeline_mode<synchronous>, transform_indices = @transform_5, window_bounds = array<i64: 1024, 8>}, {transform_indices = @transform_6, window_bounds = array<i64: 16, 128>}, {transform_indices = @transform_7, window_bounds = array<i64: 1, 128>}]} {
    %c0 = arith.constant 0 : index
    %c0_0 = arith.constant 0 : index
    %0 = vector.load %arg1[%c0, %c0_0] : memref<16x128xf32, #tpu.memory_space<vmem>>, vector<16x128xf32>
    %c0_1 = arith.constant 0 : index
    %c6 = arith.constant 6 : index
    %1 = vector.load %arg6[%c0_1, %c6] : memref<1024x8xf32, #tpu.memory_space<vmem>>, vector<16x1xf32>
    %cst = arith.constant 1.000000e+00 : f32
    %2 = vector.broadcast %cst : f32 to vector<16x1xf32>
    %3 = arith.subf %2, %1 : vector<16x1xf32>
    %4 = vector.broadcast %1 : vector<16x1xf32> to vector<16x128xf32>
    %5 = arith.mulf %0, %4 : vector<16x128xf32>
    %c0_2 = arith.constant 0 : index
    %c0_3 = arith.constant 0 : index
    %6 = vector.load %arg2[%c0_2, %c0_3] : memref<64x16xbf16, #tpu.memory_space<vmem>>, vector<64x16xbf16>
    %7 = arith.truncf %5 : vector<16x128xf32> to vector<16x128xbf16>
    %cst_4 = arith.constant dense<0.000000e+00> : vector<64x128xf32>
    %8 = tpu.matmul %6, %7, %cst_4 {dimension_numbers = #tpu.dot_dimension_numbers<[1], [0], [0], [1], [0, 0, 1, 1], [], []>} : vector<64x16xbf16>, vector<16x128xbf16>, vector<64x128xf32> -> vector<64x128xf32>
    %c0_5 = arith.constant 0 : index
    %c0_6 = arith.constant 0 : index
    %9 = vector.load %arg6[%c0_5, %c0_6] : memref<1024x8xf32, #tpu.memory_space<vmem>>, vector<64x1xf32>
    %10 = vector.broadcast %9 : vector<64x1xf32> to vector<64x128xf32>
    %11 = arith.addf %8, %10 : vector<64x128xf32>
    %12 = tpu.iota {dimensions = array<i32: 0>} : vector<64x128xi32>
    %c32_i32 = arith.constant 32 : i32
    %13 = vector.broadcast %c32_i32 : i32 to vector<64x128xi32>
    %14 = arith.cmpi slt, %12, %13 : vector<64x128xi32>
    %15 = math.tanh %11 : vector<64x128xf32>
    %cst_7 = arith.constant 0.000000e+00 : f32
    %16 = vector.broadcast %cst_7 : f32 to vector<64x128xf32>
    %17 = arith.maximumf %11, %16 : vector<64x128xf32>
    %18 = arith.select %14, %15, %17 : vector<64x128xi1>, vector<64x128xf32>
    %c0_8 = arith.constant 0 : index
    %c0_9 = arith.constant 0 : index
    %19 = vector.load %arg3[%c0_8, %c0_9] : memref<1024x64xbf16, #tpu.memory_space<vmem>>, vector<1024x64xbf16>
    %20 = arith.truncf %18 : vector<64x128xf32> to vector<64x128xbf16>
    %cst_10 = arith.constant dense<0.000000e+00> : vector<1024x128xf32>
    %21 = tpu.matmul %19, %20, %cst_10 {dimension_numbers = #tpu.dot_dimension_numbers<[1], [0], [0], [1], [0, 0, 1, 1], [], []>} : vector<1024x64xbf16>, vector<64x128xbf16>, vector<1024x128xf32> -> vector<1024x128xf32>
    %c0_11 = arith.constant 0 : index
    %c1 = arith.constant 1 : index
    %22 = vector.load %arg6[%c0_11, %c1] : memref<1024x8xf32, #tpu.memory_space<vmem>>, vector<1024x1xf32>
    %23 = vector.broadcast %22 : vector<1024x1xf32> to vector<1024x128xf32>
    %24 = arith.addf %21, %23 : vector<1024x128xf32>
    %25 = vector.extract_strided_slice %24 {offsets = [0, 0], sizes = [512, 128], strides = [1, 1]} : vector<1024x128xf32> to vector<512x128xf32>
    %26 = math.tanh %25 : vector<512x128xf32>
    %27 = vector.extract_strided_slice %24 {offsets = [512, 0], sizes = [512, 128], strides = [1, 1]} : vector<1024x128xf32> to vector<512x128xf32>
    %cst_12 = arith.constant 0.000000e+00 : f32
    %28 = vector.broadcast %cst_12 : f32 to vector<512x128xf32>
    %29 = arith.maximumf %27, %28 : vector<512x128xf32>
    %c0_13 = arith.constant 0 : index
    %c0_14 = arith.constant 0 : index
    %c0_15 = arith.constant 0 : index
    %30 = vector.load %arg4[%c0_13, %c0_14, %c0_15] : memref<2x32x512xbf16, #tpu.memory_space<vmem>>, vector<1x32x512xbf16>
    %31 = vector.shape_cast %30 : vector<1x32x512xbf16> to vector<32x512xbf16>
    %32 = arith.truncf %26 : vector<512x128xf32> to vector<512x128xbf16>
    %cst_16 = arith.constant dense<0.000000e+00> : vector<32x128xf32>
    %33 = tpu.matmul %31, %32, %cst_16 {dimension_numbers = #tpu.dot_dimension_numbers<[1], [0], [0], [1], [0, 0, 1, 1], [], []>} : vector<32x512xbf16>, vector<512x128xbf16>, vector<32x128xf32> -> vector<32x128xf32>
    %c0_17 = arith.constant 0 : index
    %c2 = arith.constant 2 : index
    %34 = vector.load %arg6[%c0_17, %c2] : memref<1024x8xf32, #tpu.memory_space<vmem>>, vector<32x1xf32>
    %35 = vector.broadcast %34 : vector<32x1xf32> to vector<32x128xf32>
    %36 = arith.addf %33, %35 : vector<32x128xf32>
    %37 = math.tanh %36 : vector<32x128xf32>
    %c1_18 = arith.constant 1 : index
    %c0_19 = arith.constant 0 : index
    %c0_20 = arith.constant 0 : index
    %38 = vector.load %arg4[%c1_18, %c0_19, %c0_20] : memref<2x32x512xbf16, #tpu.memory_space<vmem>>, vector<1x32x512xbf16>
    %39 = vector.shape_cast %38 : vector<1x32x512xbf16> to vector<32x512xbf16>
    %40 = arith.truncf %29 : vector<512x128xf32> to vector<512x128xbf16>
    %cst_21 = arith.constant dense<0.000000e+00> : vector<32x128xf32>
    %41 = tpu.matmul %39, %40, %cst_21 {dimension_numbers = #tpu.dot_dimension_numbers<[1], [0], [0], [1], [0, 0, 1, 1], [], []>} : vector<32x512xbf16>, vector<512x128xbf16>, vector<32x128xf32> -> vector<32x128xf32>
    %c0_22 = arith.constant 0 : index
    %c3 = arith.constant 3 : index
    %42 = vector.load %arg6[%c0_22, %c3] : memref<1024x8xf32, #tpu.memory_space<vmem>>, vector<32x1xf32>
    %43 = vector.broadcast %42 : vector<32x1xf32> to vector<32x128xf32>
    %44 = arith.addf %41, %43 : vector<32x128xf32>
    %cst_23 = arith.constant 0.000000e+00 : f32
    %45 = vector.broadcast %cst_23 : f32 to vector<32x128xf32>
    %46 = arith.maximumf %44, %45 : vector<32x128xf32>
    %c0_24 = arith.constant 0 : index
    %c0_25 = arith.constant 0 : index
    %c0_26 = arith.constant 0 : index
    %47 = vector.load %arg5[%c0_24, %c0_25, %c0_26] : memref<2x16x32xbf16, #tpu.memory_space<vmem>>, vector<1x16x32xbf16>
    %48 = vector.shape_cast %47 : vector<1x16x32xbf16> to vector<16x32xbf16>
    %49 = arith.truncf %37 : vector<32x128xf32> to vector<32x128xbf16>
    %cst_27 = arith.constant dense<0.000000e+00> : vector<16x128xf32>
    %50 = tpu.matmul %48, %49, %cst_27 {dimension_numbers = #tpu.dot_dimension_numbers<[1], [0], [0], [1], [0, 0, 1, 1], [], []>} : vector<16x32xbf16>, vector<32x128xbf16>, vector<16x128xf32> -> vector<16x128xf32>
    %c0_28 = arith.constant 0 : index
    %c4 = arith.constant 4 : index
    %51 = vector.load %arg6[%c0_28, %c4] : memref<1024x8xf32, #tpu.memory_space<vmem>>, vector<16x1xf32>
    %52 = vector.broadcast %51 : vector<16x1xf32> to vector<16x128xf32>
    %53 = arith.addf %50, %52 : vector<16x128xf32>
    %54 = vector.broadcast %3 : vector<16x1xf32> to vector<16x128xf32>
    %55 = arith.mulf %53, %54 : vector<16x128xf32>
    %c1_29 = arith.constant 1 : index
    %c0_30 = arith.constant 0 : index
    %c0_31 = arith.constant 0 : index
    %56 = vector.load %arg5[%c1_29, %c0_30, %c0_31] : memref<2x16x32xbf16, #tpu.memory_space<vmem>>, vector<1x16x32xbf16>
    %57 = vector.shape_cast %56 : vector<1x16x32xbf16> to vector<16x32xbf16>
    %58 = arith.truncf %46 : vector<32x128xf32> to vector<32x128xbf16>
    %cst_32 = arith.constant dense<0.000000e+00> : vector<16x128xf32>
    %59 = tpu.matmul %57, %58, %cst_32 {dimension_numbers = #tpu.dot_dimension_numbers<[1], [0], [0], [1], [0, 0, 1, 1], [], []>} : vector<16x32xbf16>, vector<32x128xbf16>, vector<16x128xf32> -> vector<16x128xf32>
    %c0_33 = arith.constant 0 : index
    %c5 = arith.constant 5 : index
    %60 = vector.load %arg6[%c0_33, %c5] : memref<1024x8xf32, #tpu.memory_space<vmem>>, vector<16x1xf32>
    %61 = vector.broadcast %60 : vector<16x1xf32> to vector<16x128xf32>
    %62 = arith.addf %59, %61 : vector<16x128xf32>
    %63 = vector.broadcast %3 : vector<16x1xf32> to vector<16x128xf32>
    %64 = arith.mulf %62, %63 : vector<16x128xf32>
    %65 = math.exp %55 : vector<16x128xf32>
    %66 = arith.mulf %0, %65 : vector<16x128xf32>
    %67 = arith.addf %66, %64 : vector<16x128xf32>
    %c0_34 = arith.constant 0 : index
    %c0_35 = arith.constant 0 : index
    %68 = vector.load %arg7[%c0_34, %c0_35] : memref<16x128xf32, #tpu.memory_space<vmem>>, vector<16x128xf32>
    tpu.vector_store %arg7[%c0_34, %c0_35], %67 {strides = array<i32>} : memref<16x128xf32, #tpu.memory_space<vmem>>, vector<16x128xf32>,
    %cst_36 = arith.constant dense<0.000000e+00> : vector<128xf32>
    %69 = vector.multi_reduction <add>, %55, %cst_36 [0] : vector<16x128xf32> to vector<128xf32>
    %70 = vector.shape_cast %69 : vector<128xf32> to vector<1x128xf32>
    %c0_37 = arith.constant 0 : index
    %c0_38 = arith.constant 0 : index
    %71 = vector.load %arg8[%c0_37, %c0_38] : memref<1x128xf32, #tpu.memory_space<vmem>>, vector<1x128xf32>
    tpu.vector_store %arg8[%c0_37, %c0_38], %70 {strides = array<i32>} : memref<1x128xf32, #tpu.memory_space<vmem>>, vector<1x128xf32>,
    return
  }
  func.func @transform_0(%arg0: i32) -> (i32, i32) {
    %c0_i32 = arith.constant 0 : i32
    %c0_i32_0 = arith.constant 0 : i32
    return %c0_i32, %arg0 : i32, i32
  }
  func.func @transform_1(%arg0: i32) -> (i32, i32) {
    %c0_i32 = arith.constant 0 : i32
    %c0_i32_0 = arith.constant 0 : i32
    %c0_i32_1 = arith.constant 0 : i32
    return %c0_i32, %c0_i32_0 : i32, i32
  }
  func.func @transform_2(%arg0: i32) -> (i32, i32) {
    %c0_i32 = arith.constant 0 : i32
    %c0_i32_0 = arith.constant 0 : i32
    %c0_i32_1 = arith.constant 0 : i32
    return %c0_i32, %c0_i32_0 : i32, i32
  }
  func.func @transform_3(%arg0: i32) -> (i32, i32, i32) {
    %c0_i32 = arith.constant 0 : i32
    %c0_i32_0 = arith.constant 0 : i32
    %c0_i32_1 = arith.constant 0 : i32
    %c0_i32_2 = arith.constant 0 : i32
    return %c0_i32, %c0_i32_0, %c0_i32_1 : i32, i32, i32
  }
  func.func @transform_4(%arg0: i32) -> (i32, i32, i32) {
    %c0_i32 = arith.constant 0 : i32
    %c0_i32_0 = arith.constant 0 : i32
    %c0_i32_1 = arith.constant 0 : i32
    %c0_i32_2 = arith.constant 0 : i32
    return %c0_i32, %c0_i32_0, %c0_i32_1 : i32, i32, i32
  }
  func.func @transform_5(%arg0: i32) -> (i32, i32) {
    %c0_i32 = arith.constant 0 : i32
    %c0_i32_0 = arith.constant 0 : i32
    %c0_i32_1 = arith.constant 0 : i32
    return %c0_i32, %c0_i32_0 : i32, i32
  }
  func.func @transform_6(%arg0: i32) -> (i32, i32) {
    %c0_i32 = arith.constant 0 : i32
    %c0_i32_0 = arith.constant 0 : i32
    return %c0_i32, %arg0 : i32, i32
  }
  func.func @transform_7(%arg0: i32) -> (i32, i32) {
    %c0_i32 = arith.constant 0 : i32
    %c0_i32_0 = arith.constant 0 : i32
    return %c0_i32, %arg0 : i32, i32
  }
}

</mosaic_0001>

<bundles_post_ra>
// kernel: tpu_custom_call.1
= control target key start
LH: loop header
LB: loop body
LE: loop exit
PB: predicated region body
PF: predicated region fallthrough
CT: control target
= control target key end

     0   :  { %13 = vsyncpa [#allocation4], 0  ;;  %s5901_s0 = inlined_call_operand.vmem [shape: f32[16,256], index: 0, kind: input, shape index: {}]   ;;  %s5902_s1 = inlined_call_operand.vmem [shape: bf16[64,16], index: 1, kind: input, shape index: {}]   ;;  %s5903_s2 = inlined_call_operand.vmem [shape: bf16[1024,64], index: 2, kind: input, shape index: {}]   ;;  %s5904_s3 = inlined_call_operand.vmem [shape: bf16[2,32,512], index: 3, kind: input, shape index: {}]   ;;  %s5905_s4 = inlined_call_operand.vmem [shape: bf16[2,16,32], index: 4, kind: input, shape index: {}]   ;;  %s5906_s5 = inlined_call_operand.vmem [shape: f32[1024,8], index: 5, kind: input, shape index: {}]   ;;  %s5907_s6 = inlined_call_operand.hbm [shape: f32[16,256], index: 6, kind: output, shape index: {0}]   ;;  %s5908_s7 = inlined_call_operand.hbm [shape: f32[1,256], index: 7, kind: output, shape index: {1}]  }
   0x1   :  { %15 = vsyncpa [#allocation4 + $0x1], 0 }
   0x2   :  { %16 = vsyncpa [#allocation6], 0 }
   0x3   :  { %18 = vsyncpa [#allocation6 + $0x1], 0  ;;  %s4320_s24 = smov 0   ;;  %s4322_s25 = smov 0  }
   0x4   :  { %s4324_s26 = smov 0   ;;  %s4326_s27 = smov 0  }
   0x5 LB: > { %s4341_s28 = sadd.s32 4294967295, %s4264_s27   ;;  %s3313_s29 = sadd.s32 4294967294, %s4264_s27   ;;  %s4264_s27 = sphi %s4326_s27, %s6024_s27   ;;  %s4260_s26 = sphi %s4324_s26, %s6023_s26   ;;  %s4256_s25 = sphi %s4322_s25, %s6022_s25   ;;  %s4252_s24 = sphi %s4320_s24, %s6021_s24  }
   0x6   : > { %s4345_s30 = sadd.s32 1, %s4264_s27   ;;  %s31_s8 = sadd.s32 1, %s4260_s26 }
   0x7   : > { %s28_s9 = ssub.s32 %s4264_s27, %s4345_s30  ;;  %p38_p0 = scmp.ne.s32.totalorder %s4260_s26, %s4256_s25 }
   0x8   : > { %p29_p1 = scmp.eq.s32.totalorder %s28_s9, 0  ;;  %p39_p2 = scmp.eq.s32.totalorder %s4264_s27, 0 }
   0x9   : > { %p173_p3 = scmp.eq.s32.totalorder %s4341_s28, 1  ;;  %p178_p4 = scmp.ne.s32.totalorder %s4256_s25, %s4252_s24 }
   0xa   : > { %s4357_s10 = scalar_select %p29_p1, %s4260_s26, %s31_s8  }
   0xb   : > { %p40_p5 = por %p39_p2, %p38_p0  ;;  %p4359_p6 = por %p173_p3, %p38_p0 }
   0xc   : > { %p179_p7 = scmp.eq.s32.totalorder %s3313_s29, 1  ;;  %p3315_p9 = scmp.ge.s32.totalorder %s4264_s27, 2 }
   0xe   : > { %p4363_p8 = por %p179_p7, %p178_p4  ;;  %236 = sbr.rel (%p3315_p9) target bundleno = 28 (0x1c), region = 36 }
  0x15   : > { %239 = sbr.rel (!%p40_p5) target bundleno = 28 (0x1c), region = 40  ;;  %s241_s13 = sand.u32 (%p40_p5), 1, %s4260_s26  }
  0x16   : > { %s3317_s14 = sshll.u32 (%p40_p5), %s4264_s27, 3  ;;  %s3316_s15 = sshll.u32 (%p40_p5), %s241_s13, 4 }
  0x17   : > { %s245_s18 = scalar_lea.vmem (%p40_p5), %s5901_s0, %s3317_s14  ;;  %s243_s19 = scalar_lea.vmem (%p40_p5), [#allocation2], %s3316_s15 }
  0x18   : > { %v275_v0 = vld [vmem:[%s245_s18] sm:$0xff] (%p40_p5)  ;;  %v277_v1 = vld [vmem:[%s245_s18 + $0x10] sm:$0xff] (%p40_p5) }
  0x19   : > { %276 = vst [vmem:[%s243_s19] sm:$0xff] (%p40_p5), %v275_v0  ;;  %278 = vst [vmem:[%s243_s19 + $0x8] sm:$0xff] (%p40_p5), %v277_v1 }
  0x1c PF: > { %p3318_p10 = scmp.ge.s32.totalorder %s4264_s27, 1  ;;  %p283_p11 = scmp.lt.s32.totalorder %s4264_s27, 3 }
  0x1e   : > { %p284_p12 = pnand %p3318_p10, %p283_p11 }
  0x20   : > { %287 = sbr.rel (%p284_p12) target bundleno = 1318 (0x526), region = 78 }
  0x27   : > { %v328_v2 = vld [vmem:[%s5906_s5] sm:$0xff]  ;;  %v5909_v3 = vmov 6   ;;  %v329_v4 = vld [vmem:[%s5906_s5 + $0x8] sm:$0xff]  ;;  %v4267_v5 = vmov 0   ;;  %vm421_vm0 = vcmask 130048   ;;  %v356_v7 = vld [vmem:[%s5906_s5 + $0x18] sm:$0xff] }
  0x28   : > { %3909 = vset.pattern.permute.xlu0 %v5909_v3  ;;  %3910 = vset.pattern.permute.xlu1 %v4267_v5  ;;  %v3924_v6 = vld [vmem:[%s5902_s1] sm:$0xff]   ;;  %v355_v9 = vld [vmem:[%s5906_s5 + $0x10] sm:$0xff]  ;;  %v358_v11 = vld [vmem:[%s5906_s5 + $0x28] sm:$0xff]  ;;  %v4268_v14 = vmov 1   ;;  %s4521_s16 = sand.u32 1, %s4256_s25   ;;  %vm1760_vm1 = vcmask 523264  }
  0x29   : > { %334 = vperm.xlu0 %3909, %v328_v2   ;;  %363 = vperm.xlu1 %3910, %v328_v2   ;;  %v357_v8 = vld [vmem:[%s5906_s5 + $0x20] sm:$0xff]  ;;  %v359_v10 = vld [vmem:[%s5906_s5 + $0x30] sm:$0xff]  ;;  %v360_v13 = vld [vmem:[%s5906_s5 + $0x38] sm:$0xff]  ;;  %s3319_s19 = sshll.u32 %s4521_s16, 4  ;;  %vm4272_vm2 = vmmov 0   ;;  %vm3048_vm3 = vcmask 261120  }
  0x2a   : > { %3685 = vmatprep.mubr.msk.bf16.mxu0 %vm421_vm0, %v3924_v6  ;;  %v688_v12 = vld [vmem:[%s5906_s5 + $0x80] sm:$0xff]  ;;  %v689_v15 = vld [vmem:[%s5906_s5 + $0x88] sm:$0xff]  ;;  %v690_v16 = vld [vmem:[%s5906_s5 + $0x90] sm:$0xff]  ;;  %s4541_s14 = scalar_lea.vmem [#allocation2], %s3319_s19  ;;  %s3489_s23 = sshll.u32 %s4341_s28, 4 }
  0x2b   : > { %v691_v17 = vld [vmem:[%s5906_s5 + $0x98] sm:$0xff]  ;;  %v692_v18 = vld [vmem:[%s5906_s5 + $0xa0] sm:$0xff]  ;;  %v693_v19 = vld [vmem:[%s5906_s5 + $0xa8] sm:$0xff]  ;;  %s324_s29 = scalar_lea.vmem [#allocation5], %s4521_s16  ;;  %s5819_s15 = scalar_lea.hbm %s5908_s7, %s3489_s23 }
  0x2c   : > { %v694_v20 = vld [vmem:[%s5906_s5 + $0xb0] sm:$0xff]  ;;  %v695_v21 = vld [vmem:[%s5906_s5 + $0xb8] sm:$0xff]  ;;  %v696_v22 = vld [vmem:[%s5906_s5 + $0xc0] sm:$0xff]  ;;  %s3220_s8 = sshll.u32 %s324_s29, 4  ;;  %s3193_s17 = scalar_lea.sflag [#allocation6], %s4521_s16  ;;  %s5821_s8 = int_to_ptr.vmem [resolvable:$true] %s3220_s8 }
  0x2d   : > { %339 = vperm.xlu0 %3909, %v329_v4   ;;  %368 = vperm.xlu1 %3910, %v329_v4   ;;  %v697_v23 = vld [vmem:[%s5906_s5 + $0xc8] sm:$0xff]  ;;  %v680_v24 = vld [vmem:[%s5906_s5 + $0x40] sm:$0xff]  ;;  %v698_v26 = vld [vmem:[%s5906_s5 + $0xd0] sm:$0xff]  ;;  %s4170_s18 = scalar_lea.vmem %s5821_s8, 16  ;;  %s4275_s20 = smov [#allocation5]  }
  0x2e   : > { %v681_v25 = vld [vmem:[%s5906_s5 + $0x48] sm:$0xff]  ;;  %v699_v27 = vld [vmem:[%s5906_s5 + $0xd8] sm:$0xff]  ;;  %v682_v28 = vld [vmem:[%s5906_s5 + $0x50] sm:$0xff]  ;;  %p4171_p13 = scmp.ne.s32.totalorder %s5821_s8, %s4170_s18  ;;  %s4174_s21 = sshll.u32 %s4275_s20, 4  ;;  %s4175_s21 = int_to_ptr.vmem [resolvable:$false] %s4174_s21 }
  0x2f   : > { %v683_v29 = vld [vmem:[%s5906_s5 + $0x58] sm:$0xff]  ;;  %v700_v30 = vld [vmem:[%s5906_s5 + $0xe0] sm:$0xff]  ;;  %v701_v31 = vld [vmem:[%s5906_s5 + $0xe8] sm:$0xff]  ;;  %s4176_s22 = scalar_lea.vmem %s4175_s21, 32  ;;  %p4177_p2 = scmp.lt.s32.totalorder %s5821_s8, %s4175_s21 }
  0x30   : > { %v684_v32 = vld [vmem:[%s5906_s5 + $0x60] sm:$0xff]  ;;  %v685_v33 = vld [vmem:[%s5906_s5 + $0x68] sm:$0xff]  ;;  %v702_v34 = vld [vmem:[%s5906_s5 + $0xf0] sm:$0xff]  ;;  %p4172_p0 = pnand %p4171_p13, %p4359_p6  ;;  %p4178_p3 = scmp.lt.s32.totalorder %s4176_s22, %s4170_s18 }
  0x31   : > { %3911 = vset.pattern.permute.xlu0 %v4267_v5  ;;  %378 = vperm.xlu1 %3910, %v356_v7   ;;  %v703_v35 = vld [vmem:[%s5906_s5 + $0xf8] sm:$0xff]  ;;  %v686_v36 = vld [vmem:[%s5906_s5 + $0x70] sm:$0xff]  ;;  %v720_v38 = vld [vmem:[%s5906_s5 + $0x180] sm:$0xff] }
  0x32   : > { %373 = vperm.xlu0 %3911, %v355_v9   ;;  %v687_v37 = vld [vmem:[%s5906_s5 + $0x78] sm:$0xff]  ;;  %v721_v39 = vld [vmem:[%s5906_s5 + $0x188] sm:$0xff]  ;;  %v704_v40 = vld [vmem:[%s5906_s5 + $0x100] sm:$0xff]  ;;  %p4173_p1 = pneg %p4172_p0  ;;  %p4179_p4 = por %p4178_p3, %p4177_p2 }
  0x33   : > { %v705_v41 = vld [vmem:[%s5906_s5 + $0x108] sm:$0xff]  ;;  %v722_v42 = vld [vmem:[%s5906_s5 + $0x190] sm:$0xff]  ;;  %v723_v43 = vld [vmem:[%s5906_s5 + $0x198] sm:$0xff] }
  0x34   : > { %v706_v44 = vld [vmem:[%s5906_s5 + $0x110] sm:$0xff]  ;;  %v707_v45 = vld [vmem:[%s5906_s5 + $0x118] sm:$0xff]  ;;  %v724_v46 = vld [vmem:[%s5906_s5 + $0x1a0] sm:$0xff]  ;;  %p4180_p5 = pnand %p4179_p4, %p4173_p1 }
  0x35   : > { %383 = vperm.xlu1 %3910, %v357_v8   ;;  %v725_v47 = vld [vmem:[%s5906_s5 + $0x1a8] sm:$0xff]  ;;  %v708_v48 = vld [vmem:[%s5906_s5 + $0x120] sm:$0xff]  ;;  %v726_v50 = vld [vmem:[%s5906_s5 + $0x1b0] sm:$0xff] }
  0x36   : > { %388 = vperm.xlu0 %3911, %v358_v11   ;;  %v709_v49 = vld [vmem:[%s5906_s5 + $0x128] sm:$0xff]  ;;  %v727_v51 = vld [vmem:[%s5906_s5 + $0x1b8] sm:$0xff]  ;;  %v710_v52 = vld [vmem:[%s5906_s5 + $0x130] sm:$0xff] }
  0x37   : > { %v711_v53 = vld [vmem:[%s5906_s5 + $0x138] sm:$0xff]  ;;  %v728_v54 = vld [vmem:[%s5906_s5 + $0x1c0] sm:$0xff]  ;;  %v729_v56 = vld [vmem:[%s5906_s5 + $0x1c8] sm:$0xff] }
  0x38   : > { %v712_v57 = vld [vmem:[%s5906_s5 + $0x140] sm:$0xff]  ;;  %v327_v59 = vld [vmem:[%s4541_s14 + $0x8] sm:$0xff]  ;;  %v730_v0 = vld [vmem:[%s5906_s5 + $0x1d0] sm:$0xff] }
  0x39   : > { %393 = vperm.xlu1 %3910, %v359_v10   ;;  %v326_v58 = vld [vmem:[%s4541_s14] sm:$0xff]  ;;  %v713_v61 = vld [vmem:[%s5906_s5 + $0x148] sm:$0xff] }
  0x3a   : > { %398 = vperm.xlu0 %3911, %v360_v13   ;;  %v714_v5 = vld [vmem:[%s5906_s5 + $0x150] sm:$0xff]  ;;  %v3984_v3 = vld [vmem:[%s5903_s2 + $0x1c0] sm:$0xff]  }
  0x3b   : > { %v3926_v6 = vld [vmem:[%s5902_s1 + $0x10] sm:$0xff]  }
  0x3d   : > { %3912 = vset.pattern.permute.xlu1 %v4268_v14 }
  0x3e   : > { %882 = vperm.xlu1 %3912, %v688_v12   ;;  %3913 = vset.pattern.permute.xlu0 %v4268_v14  ;;  %v717_v12 = vld [vmem:[%s5906_s5 + $0x168] sm:$0xff]  ;;  %v735_v14 = vld [vmem:[%s5906_s5 + $0x1f8] sm:$0xff] }
  0x3f   : > { %887 = vperm.xlu0 %3913, %v689_v15   ;;  %v718_v15 = vld [vmem:[%s5906_s5 + $0x170] sm:$0xff] }
  0x42   : > { %802 = vperm.xlu1 %3912, %v328_v2   ;;  %v731_v2 = vld [vmem:[%s5906_s5 + $0x1d8] sm:$0xff] }
  0x43   : > { %892 = vperm.xlu0 %3913, %v690_v16   ;;  %v719_v16 = vld [vmem:[%s5906_s5 + $0x178] sm:$0xff] }
  0x46   : > { %807 = vperm.xlu1 %3912, %v329_v4   ;;  %v3925_v4 = vld [vmem:[%s5902_s1 + $0x8] sm:$0xff]  }
  0x47   : > { %812 = vperm.xlu0 %3913, %v355_v9   ;;  %v733_v9 = vld [vmem:[%s5906_s5 + $0x1e8] sm:$0xff] }
  0x4a   : > { %897 = vperm.xlu1 %3912, %v691_v17   ;;  %v752_v17 = vld [vmem:[%s5906_s5 + $0x280] sm:$0xff] }
  0x4b   : > { %902 = vperm.xlu0 %3913, %v692_v18   ;;  %v753_v18 = vld [vmem:[%s5906_s5 + $0x288] sm:$0xff] }
  0x4e   : > { %817 = vperm.xlu1 %3912, %v356_v7   ;;  %v715_v7 = vld [vmem:[%s5906_s5 + $0x158] sm:$0xff] }
  0x4f   : > { %822 = vperm.xlu0 %3913, %v357_v8   ;;  %v732_v8 = vld [vmem:[%s5906_s5 + $0x1e0] sm:$0xff] }
  0x52   : > { %907 = vperm.xlu1 %3912, %v693_v19   ;;  %v736_v19 = vld [vmem:[%s5906_s5 + $0x200] sm:$0xff] }
  0x53   : > { %912 = vperm.xlu0 %3913, %v694_v20   ;;  %v737_v20 = vld [vmem:[%s5906_s5 + $0x208] sm:$0xff] }
  0x56   : > { %827 = vperm.xlu1 %3912, %v358_v11   ;;  %v716_v11 = vld [vmem:[%s5906_s5 + $0x160] sm:$0xff] }
  0x57   : > { %832 = vperm.xlu0 %3913, %v359_v10   ;;  %v3927_v10 = vld [vmem:[%s5902_s1 + $0x18] sm:$0xff]  }
  0x5a   : > { %917 = vperm.xlu1 %3912, %v695_v21   ;;  %v754_v21 = vld [vmem:[%s5906_s5 + $0x290] sm:$0xff] }
  0x5b   : > { %922 = vperm.xlu0 %3913, %v696_v22  }
  0x5e   : > { %837 = vperm.xlu1 %3912, %v360_v13   ;;  %v734_v13 = vld [vmem:[%s5906_s5 + $0x1f0] sm:$0xff] }
  0x5f   : > { %842 = vperm.xlu0 %3913, %v680_v24   ;;  %v738_v24 = vld [vmem:[%s5906_s5 + $0x210] sm:$0xff] }
  0x62   : > { %927 = vperm.xlu1 %3912, %v697_v23   ;;  %v755_v23 = vld [vmem:[%s5906_s5 + $0x298] sm:$0xff] }
  0x63   : > { %932 = vperm.xlu0 %3913, %v698_v26  }
  0x66   : > { %847 = vperm.xlu1 %3912, %v681_v25   ;;  %v739_v25 = vld [vmem:[%s5906_s5 + $0x218] sm:$0xff] }
  0x67   : > { %852 = vperm.xlu0 %3913, %v682_v28   ;;  %v757_v28 = vld [vmem:[%s5906_s5 + $0x2a8] sm:$0xff] }
  0x6a   : > { %937 = vperm.xlu1 %3912, %v699_v27   ;;  %v756_v27 = vld [vmem:[%s5906_s5 + $0x2a0] sm:$0xff] }
  0x6b   : > { %942 = vperm.xlu0 %3913, %v700_v30  }
  0x6e   : > { %857 = vperm.xlu1 %3912, %v683_v29   ;;  %v740_v29 = vld [vmem:[%s5906_s5 + $0x220] sm:$0xff] }
  0x6f   : > { %862 = vperm.xlu0 %3913, %v684_v32   ;;  %v758_v32 = vld [vmem:[%s5906_s5 + $0x2b0] sm:$0xff] }
  0x72   : > { %947 = vperm.xlu1 %3912, %v701_v31   ;;  %v741_v31 = vld [vmem:[%s5906_s5 + $0x228] sm:$0xff] }
  0x73   : > { %952 = vperm.xlu0 %3913, %v702_v34  }
  0x76   : > { %867 = vperm.xlu1 %3912, %v685_v33   ;;  %v759_v33 = vld [vmem:[%s5906_s5 + $0x2b8] sm:$0xff] }
  0x77   : > { %872 = vperm.xlu0 %3913, %v686_v36   ;;  %v743_v36 = vld [vmem:[%s5906_s5 + $0x238] sm:$0xff] }
  0x7a   : > { %957 = vperm.xlu1 %3912, %v703_v35   ;;  %v742_v35 = vld [vmem:[%s5906_s5 + $0x230] sm:$0xff] }
  0x7b   : > { %1042 = vperm.xlu0 %3913, %v720_v38  }
  0x7e   : > { %877 = vperm.xlu1 %3912, %v687_v37   ;;  %v760_v37 = vld [vmem:[%s5906_s5 + $0x2c0] sm:$0xff] }
  0x7f   : > { %962 = vperm.xlu0 %3913, %v704_v40   ;;  %v744_v40 = vld [vmem:[%s5906_s5 + $0x240] sm:$0xff] }
  0x82   : > { %1047 = vperm.xlu1 %3912, %v721_v39   ;;  %v761_v39 = vld [vmem:[%s5906_s5 + $0x2c8] sm:$0xff] }
  0x83   : > { %1052 = vperm.xlu0 %3913, %v722_v42  }
  0x86   : > { %967 = vperm.xlu1 %3912, %v705_v41   ;;  %v745_v41 = vld [vmem:[%s5906_s5 + $0x248] sm:$0xff] }
  0x87   : > { %972 = vperm.xlu0 %3913, %v706_v44  }
  0x8a   : > { %1057 = vperm.xlu1 %3912, %v723_v43   ;;  %v762_v43 = vld [vmem:[%s5906_s5 + $0x2d0] sm:$0xff] }
  0x8b   : > { %1062 = vperm.xlu0 %3913, %v724_v46   ;;  %v746_v46 = vld [vmem:[%s5906_s5 + $0x250] sm:$0xff] }
  0x8e   : > { %977 = vperm.xlu1 %3912, %v707_v45   ;;  %v763_v45 = vld [vmem:[%s5906_s5 + $0x2d8] sm:$0xff] }
  0x8f   : > { %982 = vperm.xlu0 %3913, %v708_v48   ;;  %v747_v48 = vld [vmem:[%s5906_s5 + $0x258] sm:$0xff] }
  0x92   : > { %1067 = vperm.xlu1 %3912, %v725_v47  }
  0x93   : > { %1072 = vperm.xlu0 %3913, %v726_v50   ;;  %v764_v50 = vld [vmem:[%s5906_s5 + $0x2e0] sm:$0xff] }
  0x96   : > { %987 = vperm.xlu1 %3912, %v709_v49  }
  0x97   : > { %992 = vperm.xlu0 %3913, %v710_v52  }
  0x9a   : > { %1077 = vperm.xlu1 %3912, %v727_v51   ;;  %v765_v51 = vld [vmem:[%s5906_s5 + $0x2e8] sm:$0xff] }
  0x9b   : > { %1082 = vperm.xlu0 %3913, %v728_v54  }
  0x9e   : > { %997 = vperm.xlu1 %3912, %v711_v53   ;;  %v748_v53 = vld [vmem:[%s5906_s5 + $0x260] sm:$0xff] }
  0x9f   : > { %1002 = vperm.xlu0 %3913, %v712_v57   ;;  %v767_v57 = vld [vmem:[%s5906_s5 + $0x2f8] sm:$0xff] }
  0xa2   : > { %1087 = vperm.xlu1 %3912, %v729_v56  }
  0xa3   : > { %1092 = vperm.xlu0 %3913, %v730_v0  }
  0xa6   : > { %1007 = vperm.xlu1 %3912, %v713_v61  }
  0xa7   : > { %1012 = vperm.xlu0 %3913, %v714_v5  }
  0xa8   : > { %v335_v55 = vpop.permute.xlu0 %334  ;;  %v4611_v22 = vpop.permute.xlu1 %363 }
  0xa9   : > { %v342_v62 = vmul.f32 %v335_v55, %v326_v58  ;;  %v749_v55 = vld [vmem:[%s5906_s5 + $0x268] sm:$0xff] }
  0xaa   : > { %1097 = vperm.xlu1 %3912, %v731_v2   ;;  %v769_v2 = vld [vmem:[%s5906_s5 + $0x308] sm:$0xff] }
  0xab   : > { %1102 = vperm.xlu0 %3913, %v732_v8  }
  0xac   : > { %v340_v60 = vpop.permute.xlu0 %339  ;;  %v4622_v26 = vpop.permute.xlu1 %368 }
  0xad   : > { %v343_v63 = vmul.f32 %v340_v60, %v327_v59  ;;  %v751_v59 = vld [vmem:[%s5906_s5 + $0x278] sm:$0xff] }
  0xae   : > { %1017 = vperm.xlu1 %3912, %v715_v7   ;;  %v784_v7 = vld [vmem:[%s5906_s5 + $0x380] sm:$0xff] }
  0xaf   : > { %v352_v1 = vpack.c.bf16 %v343_v63, %v342_v62  ;;  %1022 = vperm.xlu0 %3913, %v716_v11   ;;  %v785_v62 = vld [vmem:[%s5906_s5 + $0x388] sm:$0xff]  ;;  %v766_v63 = vld [vmem:[%s5906_s5 + $0x2f0] sm:$0xff] }
  0xb0   : > { %v4633_v30 = vpop.permute.xlu1 %378 }
  0xb1   : > { %3683 = vmatprep.subr.bf16.mxu0 %v352_v1  ;;  %v4671_v44 = vpop.permute.xlu0 %373 }
  0xb2   : > { %3684 = vmatpush3.bf16.msra.mxu0 %v352_v1  ;;  %1107 = vperm.xlu1 %3912, %v733_v9   ;;  %v771_v9 = vld [vmem:[%s5906_s5 + $0x318] sm:$0xff] }
  0xb3   : > { %1112 = vperm.xlu0 %3913, %v734_v13   ;;  %v786_v13 = vld [vmem:[%s5906_s5 + $0x390] sm:$0xff] }
  0xb4   : > { %v4644_v34 = vpop.permute.xlu1 %383 }
  0xb5   : > { %3686 = vmatmul.mubr.msk.bf16.vlgmr.msra.gmra.mrb[0].mxu0 %vm421_vm0, %v3925_v4  ;;  %v4684_v49 = vpop.permute.xlu0 %388  ;;  %v750_v4 = vld [vmem:[%s5906_s5 + $0x270] sm:$0xff] }
  0xb6   : > { %3689 = vmatprep.mubr.msk.bf16.mxu0 %vm421_vm0, %v3926_v6  ;;  %1027 = vperm.xlu1 %3912, %v717_v12   ;;  %v787_v6 = vld [vmem:[%s5906_s5 + $0x398] sm:$0xff]  ;;  %v789_v12 = vld [vmem:[%s5906_s5 + $0x3a8] sm:$0xff] }
  0xb7   : > { %1032 = vperm.xlu0 %3913, %v718_v15  }
  0xb8   : > { %v4655_v38 = vpop.permute.xlu1 %393 }
  0xb9   : > { %v4697_v54 = vpop.permute.xlu0 %398 }
  0xba   : > { %1117 = vperm.xlu1 %3912, %v735_v14  }
  0xbb   : > { %1202 = vperm.xlu0 %3913, %v752_v17   ;;  %v770_v17 = vld [vmem:[%s5906_s5 + $0x310] sm:$0xff] }
  0xbd   : > { %3690 = vmatmul.mubr.msk.bf16.gmra.mrb[4].mxu0 %vm421_vm0, %v3927_v10  ;;  %v4666_v42 = vpop.permute.xlu1 %882  ;;  %v768_v10 = vld [vmem:[%s5906_s5 + $0x300] sm:$0xff] }
  0xbe   : > { %1037 = vperm.xlu1 %3912, %v719_v16   ;;  %v4707_v58 = vpop.permute.xlu0 %887  ;;  %v773_v16 = vld [vmem:[%s5906_s5 + $0x328] sm:$0xff] }
  0xbf   : > { %1122 = vperm.xlu0 %3913, %v736_v19   ;;  %v791_v19 = vld [vmem:[%s5906_s5 + $0x3b8] sm:$0xff] }
  0xc1   : > { %v4679_v47 = vpop.permute.xlu1 %802 }
  0xc2   : > { %1207 = vperm.xlu1 %3912, %v753_v18   ;;  %v4714_v61 = vpop.permute.xlu0 %892 }
  0xc3   : > { %1212 = vperm.xlu0 %3913, %v754_v21  }
  0xc5   : > { %v4692_v52 = vpop.permute.xlu1 %807 }
  0xc6   : > { %1127 = vperm.xlu1 %3912, %v737_v20   ;;  %v4724_v1 = vpop.permute.xlu0 %812  ;;  %v788_v20 = vld [vmem:[%s5906_s5 + $0x3a0] sm:$0xff] }
  0xc7   : > { %1132 = vperm.xlu0 %3913, %v738_v24   ;;  %v775_v24 = vld [vmem:[%s5906_s5 + $0x338] sm:$0xff] }
  0xc9   : > { %v4702_v56 = vpop.permute.xlu1 %897 }
  0xca   : > { %1217 = vperm.xlu1 %3912, %v755_v23   ;;  %v4740_v8 = vpop.permute.xlu0 %902 }
  0xcb   : > { %1222 = vperm.xlu0 %3913, %v756_v27   ;;  %v3928_v27 = vld [vmem:[%s5903_s2 + $0x70] sm:$0xff]  }
  0xcc   : > { %3729 = vmatprep.mubr.msk.bf16.mxu1 %vm1760_vm1, %v3928_v27 }
  0xcd   : > { %v4712_v60 = vpop.permute.xlu1 %817 }
  0xce   : > { %1137 = vperm.xlu1 %3912, %v739_v25   ;;  %v4756_v14 = vpop.permute.xlu0 %822  ;;  %v772_v25 = vld [vmem:[%s5906_s5 + $0x320] sm:$0xff] }
  0xcf   : > { %1142 = vperm.xlu0 %3913, %v740_v29   ;;  %v793_v29 = vld [vmem:[%s5906_s5 + $0x3c8] sm:$0xff] }
  0xd1   : > { %v4722_v0 = vpop.permute.xlu1 %907 }
  0xd2   : > { %1227 = vperm.xlu1 %3912, %v757_v28   ;;  %v4766_v18 = vpop.permute.xlu0 %912  ;;  %v3929_v28 = vld [vmem:[%s5903_s2] sm:$0xff]  }
  0xd3   : > { %1232 = vperm.xlu0 %3913, %v758_v32   ;;  %v790_v32 = vld [vmem:[%s5906_s5 + $0x3b0] sm:$0xff]  ;;  %3701 = vmatprep.mubr.msk.bf16.mxu0 %vm1760_vm1, %v3929_v28 }
  0xd5   : > { %v4732_v5 = vpop.permute.xlu1 %827 }
  0xd6   : > { %1147 = vperm.xlu1 %3912, %v741_v31   ;;  %v4776_v23 = vpop.permute.xlu0 %832 }
  0xd7   : > { %1152 = vperm.xlu0 %3913, %v742_v35   ;;  %v777_v35 = vld [vmem:[%s5906_s5 + $0x348] sm:$0xff] }
  0xd9   : > { %v4748_v11 = vpop.permute.xlu1 %917 }
  0xda   : > { %1237 = vperm.xlu1 %3912, %v759_v33   ;;  %v4800_v33 = vpop.permute.xlu0 %922 }
  0xdb   : > { %1242 = vperm.xlu0 %3913, %v760_v37   ;;  %5916 = vst [vmem:[#allocation10_spill] sm:$0xff] %v4800_v33 }
  0xdd   : > { %v4758_v15 = vpop.permute.xlu1 %837 }
  0xde   : > { %1157 = vperm.xlu1 %3912, %v743_v36   ;;  %v774_v36 = vld [vmem:[%s5906_s5 + $0x330] sm:$0xff] }
  0xdf   : > { %1162 = vperm.xlu0 %3913, %v744_v40   ;;  %v792_v40 = vld [vmem:[%s5906_s5 + $0x3c0] sm:$0xff] }
  0xe1   : > { %v4774_v21 = vpop.permute.xlu1 %927 }
  0xe2   : > { %1247 = vperm.xlu1 %3912, %v761_v39   ;;  %5915 = vst [vmem:[#allocation9_spill] sm:$0xff] %v4774_v21  ;;  %v795_v39 = vld [vmem:[%s5906_s5 + $0x3d8] sm:$0xff] }
  0xe3   : > { %1252 = vperm.xlu0 %3913, %v762_v43   ;;  %v779_v43 = vld [vmem:[%s5906_s5 + $0x358] sm:$0xff] }
  0xe5   : > { %v4793_v31 = vpop.permute.xlu1 %847 }
  0xe6   : > { %1167 = vperm.xlu1 %3912, %v745_v41   ;;  %v4816_v41 = vpop.permute.xlu0 %842 }
  0xe7   : > { %1172 = vperm.xlu0 %3913, %v746_v46  }
  0xe9   : > { %v4808_v37 = vpop.permute.xlu1 %937 }
  0xea   : > { %1257 = vperm.xlu1 %3912, %v763_v45   ;;  %5917 = vst [vmem:[#allocation11_spill] sm:$0xff] %v4808_v37  ;;  %v776_v45 = vld [vmem:[%s5906_s5 + $0x340] sm:$0xff] }
  0xeb   : > { %1262 = vperm.xlu0 %3913, %v764_v50   ;;  %v797_v50 = vld [vmem:[%s5906_s5 + $0x3e8] sm:$0xff] }
  0xed   : > { %v4824_v46 = vpop.permute.xlu1 %857 }
  0xee   : > { %1177 = vperm.xlu1 %3912, %v747_v48   ;;  %v4826_v48 = vpop.permute.xlu0 %932 }
  0xef   : > { %1182 = vperm.xlu0 %3913, %v748_v53  }
  0xf1   : > { %v4834_v53 = vpop.permute.xlu1 %947 }
  0xf2   : > { %1267 = vperm.xlu1 %3912, %v765_v51   ;;  %v794_v51 = vld [vmem:[%s5906_s5 + $0x3d0] sm:$0xff] }
  0xf3   : > { %1272 = vperm.xlu0 %3913, %v766_v63   ;;  %v796_v63 = vld [vmem:[%s5906_s5 + $0x3e0] sm:$0xff] }
  0xf6   : > { %1187 = vperm.xlu1 %3912, %v749_v55   ;;  %v781_v55 = vld [vmem:[%s5906_s5 + $0x368] sm:$0xff] }
  0xf7   : > { %1192 = vperm.xlu0 %3913, %v750_v4  }
  0xfa   : > { %1277 = vperm.xlu1 %3912, %v767_v57   ;;  %v778_v57 = vld [vmem:[%s5906_s5 + $0x350] sm:$0xff] }
  0xfb   : > { %1362 = vperm.xlu0 %3913, %v784_v7   ;;  %v780_v7 = vld [vmem:[%s5906_s5 + $0x360] sm:$0xff] }
  0xfe   : > { %1197 = vperm.xlu1 %3912, %v751_v59   ;;  %v4842_v59 = vpop.permute.xlu0 %852 }
  0xff   : > { %1282 = vperm.xlu0 %3913, %v768_v10   ;;  %v798_v10 = vld [vmem:[%s5906_s5 + $0x3f0] sm:$0xff] }
 0x102   : > { %1367 = vperm.xlu1 %3912, %v785_v62   ;;  %v799_v62 = vld [vmem:[%s5906_s5 + $0x3f8] sm:$0xff]  ;;  %v4852_v4 = vpop.permute.xlu0 %942 }
 0x103   : > { %1372 = vperm.xlu0 %3913, %v786_v13   ;;  %v782_v13 = vld [vmem:[%s5906_s5 + $0x370] sm:$0xff] }
 0x106   : > { %1287 = vperm.xlu1 %3912, %v769_v2   ;;  %v4850_v2 = vpop.permute.xlu1 %867 }
 0x107   : > { %1292 = vperm.xlu0 %3913, %v770_v17  }
 0x10a   : > { %1377 = vperm.xlu1 %3912, %v787_v6   ;;  %v783_v6 = vld [vmem:[%s5906_s5 + $0x378] sm:$0xff] }
 0x10b   : > { %1382 = vperm.xlu0 %3913, %v788_v20  }
 0x10e   : > { %1297 = vperm.xlu1 %3912, %v771_v9   ;;  %v4860_v9 = vpop.permute.xlu1 %957 }
 0x10f   : > { %1302 = vperm.xlu0 %3913, %v772_v25  }
 0x112   : > { %1387 = vperm.xlu1 %3912, %v789_v12   ;;  %v4865_v12 = vpop.permute.xlu0 %862 }
 0x113   : > { %1392 = vperm.xlu0 %3913, %v790_v32  }
 0x116   : > { %1307 = vperm.xlu1 %3912, %v773_v16   ;;  %v4870_v16 = vpop.permute.xlu0 %952 }
 0x117   : > { %1312 = vperm.xlu0 %3913, %v774_v36  }
 0x11a   : > { %1397 = vperm.xlu1 %3912, %v791_v19  }
 0x11b   : > { %1402 = vperm.xlu0 %3913, %v792_v40  }
 0x11e   : > { %1317 = vperm.xlu1 %3912, %v775_v24  }
 0x11f   : > { %1322 = vperm.xlu0 %3913, %v776_v45  }
 0x122   : > { %1407 = vperm.xlu1 %3912, %v793_v29  }
 0x123   : > { %1412 = vperm.xlu0 %3913, %v794_v51  }
 0x126   : > { %1327 = vperm.xlu1 %3912, %v777_v35  }
 0x127   : > { %1332 = vperm.xlu0 %3913, %v778_v57  }
 0x12a   : > { %1417 = vperm.xlu1 %3912, %v795_v39  }
 0x12b   : > { %1422 = vperm.xlu0 %3913, %v796_v63  }
 0x12e   : > { %1337 = vperm.xlu1 %3912, %v779_v43  }
 0x12f   : > { %1342 = vperm.xlu0 %3913, %v780_v7  }
 0x132   : > { %1427 = vperm.xlu1 %3912, %v797_v50  }
 0x133   : > { %1432 = vperm.xlu0 %3913, %v798_v10   ;;  %v3933_v10 = vld [vmem:[%s5903_s2 + $0x80] sm:$0xff]  }
 0x136   : > { %1347 = vperm.xlu1 %3912, %v781_v55  }
 0x137   : > { %1352 = vperm.xlu0 %3913, %v782_v13   ;;  %v3934_v13 = vld [vmem:[%s5903_s2 + $0x18] sm:$0xff]  }
 0x13a   : > { %1437 = vperm.xlu1 %3912, %v799_v62  }
 0x13e   : > { %1357 = vperm.xlu1 %3912, %v783_v6  }
 0x188   : > { %v3687_v17 = vpop.f32.mrb[0].mxu0 }
 0x189   : > { %v477_v19 = vadd.f32 %v3687_v17, %v4671_v44  ;;  %v468_v20 = vpop.f32.mrb[1].mxu0  ;;  %v3935_v17 = vld [vmem:[%s5903_s2 + $0x88] sm:$0xff]  }
 0x18a   : > { %v469_v24 = vadd.f32 %v468_v20, %v4611_v22  ;;  %v3688_v25 = vpop.f32.mrb[2].mxu0  ;;  %v3937_v20 = vld [vmem:[%s5903_s2 + $0x90] sm:$0xff]  }
 0x18b   : > { %4018 = vtanh.f32 %v477_v19  ;;  %v480_v27 = vadd.f32 %v3688_v25, %v4633_v30  ;;  %v471_v28 = vpop.f32.mrb[3].mxu0  ;;  %v3936_v19 = vld [vmem:[%s5903_s2 + $0x20] sm:$0xff]   ;;  %v3939_v25 = vld [vmem:[%s5903_s2 + $0x98] sm:$0xff]  }
 0x18c   : > { %4020 = vtanh.f32 %v469_v24  ;;  %v472_v29 = vadd.f32 %v471_v28, %v4622_v26  ;;  %v3938_v24 = vld [vmem:[%s5903_s2 + $0x28] sm:$0xff]   ;;  %v3941_v28 = vld [vmem:[%s5903_s2 + $0xa0] sm:$0xff]  }
 0x18d   : > { %4022 = vtanh.f32 %v480_v27  ;;  %v3940_v27 = vld [vmem:[%s5903_s2 + $0x30] sm:$0xff]  }
 0x18e   : > { %4024 = vtanh.f32 %v472_v29  ;;  %v3942_v29 = vld [vmem:[%s5903_s2 + $0x38] sm:$0xff]  }
 0x190   : > { %v3691_v32 = vpop.f32.mrb[4].mxu0 }
 0x191   : > { %v493_v35 = vadd.f32 %v3691_v32, %v4655_v38  ;;  %v484_v36 = vpop.f32.mrb[5].mxu0  ;;  %v3943_v32 = vld [vmem:[%s5903_s2 + $0xa8] sm:$0xff]  }
 0x192   : > { %v485_v39 = vadd.f32 %v484_v36, %v4644_v34  ;;  %v3692_v44 = vpop.f32.mrb[6].mxu0  ;;  %v3930_v34 = vld [vmem:[%s5903_s2 + $0x8] sm:$0xff]   ;;  %v3945_v36 = vld [vmem:[%s5903_s2 + $0xb0] sm:$0xff]  }
 0x193   : > { %v496_v40 = vadd.f32 %v3692_v44, %v4697_v54  ;;  %v487_v22 = vpop.f32.mrb[7].mxu0  ;;  %v530_v30 = vmax.f32 %v493_v35, 0.0  ;;  %v3932_v54 = vld [vmem:[%s5903_s2 + $0x10] sm:$0xff]   ;;  %v3944_v35 = vld [vmem:[%s5903_s2 + $0x40] sm:$0xff]   ;;  %v3947_v44 = vld [vmem:[%s5903_s2 + $0xb8] sm:$0xff]  }
 0x194   : > { %v488_v43 = vadd.f32 %v487_v22, %v4684_v49  ;;  %v528_v55 = vmax.f32 %v485_v39, 0.0  ;;  %v3931_v49 = vld [vmem:[%s5903_s2 + $0x78] sm:$0xff]   ;;  %v3946_v39 = vld [vmem:[%s5903_s2 + $0x48] sm:$0xff]   ;;  %v3949_v22 = vld [vmem:[%s5903_s2 + $0xc0] sm:$0xff]  }
 0x195   : > { %v4019_v45 = vpop.eup %4018  ;;  %v531_v50 = vmax.f32 %v496_v40, 0.0  ;;  %v3948_v40 = vld [vmem:[%s5903_s2 + $0x50] sm:$0xff]  }
 0x196   : > { %v4021_v51 = vpop.eup %4020  ;;  %v529_v26 = vmax.f32 %v488_v43, 0.0  ;;  %v3950_v43 = vld [vmem:[%s5903_s2 + $0x58] sm:$0xff]  }
 0x197   : > { %v4023_v57 = vpop.eup %4022  ;;  %v671_v62 = vpack.c.bf16 %v531_v50, %v530_v30  ;;  %v3952_v30 = vld [vmem:[%s5903_s2 + $0x60] sm:$0xff]   ;;  %v3953_v50 = vld [vmem:[%s5903_s2 + $0xd0] sm:$0xff]  }
 0x198   : > { %v4025_v63 = vpop.eup %4024  ;;  %v670_v6 = vpack.c.bf16 %v529_v26, %v528_v55  ;;  %v669_v38 = vpack.c.bf16 %v4023_v57, %v4019_v45  ;;  %v3951_v45 = vld [vmem:[%s5903_s2 + $0xc8] sm:$0xff]   ;;  %v3955_v55 = vld [vmem:[%s5903_s2 + $0xd8] sm:$0xff]   ;;  %v3956_v26 = vld [vmem:[%s5903_s2 + $0xe0] sm:$0xff]  }
 0x199   : > { %v668_v7 = vpack.c.bf16 %v4025_v63, %v4021_v51  ;;  %v3954_v51 = vld [vmem:[%s5903_s2 + $0x68] sm:$0xff]   ;;  %v3959_v63 = vld [vmem:[%s5903_s2 + $0xf8] sm:$0xff]  }
 0x19a   : > { %v3957_v57 = vld [vmem:[%s5903_s2 + $0xe8] sm:$0xff]  }
 0x19b   : > { %3693 = vmatprep.subr.bf16.mxu0 %v668_v7  ;;  %3845 = vmatprep.subr.bf16.mxu1 %v668_v7 }
 0x19c   : > { %3694 = vmatpush3.bf16.msra.mxu0 %v668_v7  ;;  %3849 = vmatpush3.bf16.msra.mxu1 %v668_v7  ;;  %v3962_v7 = vld [vmem:[%s5903_s2 + $0x110] sm:$0xff]  }
 0x19d   : > { %3695 = vmatprep.subr.bf16.mxu0 %v669_v38  ;;  %3846 = vmatprep.subr.bf16.mxu1 %v669_v38 }
 0x1a0   : > { %3696 = vmatpush3.bf16.msra.mxu0 %v669_v38  ;;  %3850 = vmatpush3.bf16.msra.mxu1 %v669_v38  ;;  %v3961_v38 = vld [vmem:[%s5903_s2 + $0x108] sm:$0xff]  }
 0x1a1   : > { %3697 = vmatprep.subr.bf16.mxu0 %v670_v6  ;;  %3847 = vmatprep.subr.bf16.mxu1 %v670_v6 }
 0x1a4   : > { %3698 = vmatpush3.bf16.msra.mxu0 %v670_v6  ;;  %3851 = vmatpush3.bf16.msra.mxu1 %v670_v6  ;;  %v3960_v6 = vld [vmem:[%s5903_s2 + $0x100] sm:$0xff]  }
 0x1a5   : > { %3699 = vmatprep.subr.bf16.mxu0 %v671_v62  ;;  %3848 = vmatprep.subr.bf16.mxu1 %v671_v62 }
 0x1a8   : > { %3700 = vmatpush3.bf16.msra.mxu0 %v671_v62  ;;  %3852 = vmatpush3.bf16.msra.mxu1 %v671_v62  ;;  %v3958_v62 = vld [vmem:[%s5903_s2 + $0xf0] sm:$0xff]  }
 0x1ab   : > { %3702 = vmatmul.mubr.msk.bf16.vlgmr.msra.gmra.mrb[8].mxu0 %vm1760_vm1, %v3930_v34  ;;  %3730 = vmatmul.mubr.msk.bf16.vlgmr.msra.gmra.mrb[0].mxu1 %vm1760_vm1, %v3931_v49  ;;  %v5010_v34 = vpop.permute.xlu1 %877  ;;  %v5012_v49 = vpop.permute.xlu0 %872 }
 0x1ac   : > { %3705 = vmatprep.mubr.msk.bf16.mxu0 %vm1760_vm1, %v3932_v54  ;;  %3733 = vmatprep.mubr.msk.bf16.mxu1 %vm1760_vm1, %v3933_v10  ;;  %v3963_v54 = vld [vmem:[%s5903_s2 + $0x118] sm:$0xff]   ;;  %v3964_v10 = vld [vmem:[%s5903_s2 + $0x120] sm:$0xff]  }
 0x1b3   : > { %3706 = vmatmul.mubr.msk.bf16.gmra.mrb[12].mxu0 %vm1760_vm1, %v3934_v13  ;;  %3734 = vmatmul.mubr.msk.bf16.gmra.mrb[4].mxu1 %vm1760_vm1, %v3935_v17  ;;  %v5022_v13 = vpop.permute.xlu1 %1047  ;;  %v5024_v17 = vpop.permute.xlu0 %1042 }
 0x1b4   : > { %3709 = vmatprep.mubr.msk.bf16.mxu0 %vm1760_vm1, %v3936_v19  ;;  %3737 = vmatprep.mubr.msk.bf16.mxu1 %vm1760_vm1, %v3937_v20 }
 0x1b7   : > { %v5028_v19 = vpop.permute.xlu1 %967  ;;  %v5030_v20 = vpop.permute.xlu0 %962 }
 0x1bb   : > { %3710 = vmatmul.mubr.msk.bf16.gmra.mrb[16].mxu0 %vm1760_vm1, %v3938_v24  ;;  %3738 = vmatmul.mubr.msk.bf16.gmra.mrb[8].mxu1 %vm1760_vm1, %v3939_v25  ;;  %v3965_v24 = vld [vmem:[%s5903_s2 + $0x128] sm:$0xff]   ;;  %v3966_v25 = vld [vmem:[%s5903_s2 + $0x130] sm:$0xff]  }
 0x1bc   : > { %3713 = vmatprep.mubr.msk.bf16.mxu0 %vm1760_vm1, %v3940_v27  ;;  %3741 = vmatprep.mubr.msk.bf16.mxu1 %vm1760_vm1, %v3941_v28  ;;  %v5040_v27 = vpop.permute.xlu1 %1057  ;;  %v5042_v28 = vpop.permute.xlu0 %1052 }
 0x1c3   : > { %3714 = vmatmul.mubr.msk.bf16.gmra.mrb[20].mxu0 %vm1760_vm1, %v3942_v29  ;;  %3742 = vmatmul.mubr.msk.bf16.gmra.mrb[12].mxu1 %vm1760_vm1, %v3943_v32  ;;  %v3967_v29 = vld [vmem:[%s5903_s2 + $0x138] sm:$0xff]   ;;  %v3968_v32 = vld [vmem:[%s5903_s2 + $0x140] sm:$0xff]  }
 0x1c4   : > { %3717 = vmatprep.mubr.msk.bf16.mxu0 %vm1760_vm1, %v3944_v35  ;;  %3745 = vmatprep.mubr.msk.bf16.mxu1 %vm1760_vm1, %v3945_v36  ;;  %v5050_v35 = vpop.permute.xlu1 %977  ;;  %v5052_v36 = vpop.permute.xlu0 %972 }
 0x1cb   : > { %3718 = vmatmul.mubr.msk.bf16.gmra.mrb[24].mxu0 %vm1760_vm1, %v3946_v39  ;;  %3746 = vmatmul.mubr.msk.bf16.gmra.mrb[16].mxu1 %vm1760_vm1, %v3947_v44  ;;  %v3969_v39 = vld [vmem:[%s5903_s2 + $0x148] sm:$0xff]   ;;  %v3970_v44 = vld [vmem:[%s5903_s2 + $0x150] sm:$0xff]  }
 0x1cc   : > { %3721 = vmatprep.mubr.msk.bf16.mxu0 %vm1760_vm1, %v3948_v40  ;;  %3749 = vmatprep.mubr.msk.bf16.mxu1 %vm1760_vm1, %v3949_v22  ;;  %v5062_v40 = vpop.permute.xlu1 %1067  ;;  %v5064_v22 = vpop.permute.xlu0 %1062 }
 0x1cd   : > { %5918 = vst [vmem:[#allocation12_spill] sm:$0xff] %v5062_v40  ;;  %5919 = vst [vmem:[#allocation13_spill] sm:$0xff] %v5064_v22 }
 0x1d3   : > { %3722 = vmatmul.mubr.msk.bf16.gmra.mrb[28].mxu0 %vm1760_vm1, %v3950_v43  ;;  %3750 = vmatmul.mubr.msk.bf16.gmra.mrb[20].mxu1 %vm1760_vm1, %v3951_v45  ;;  %v5068_v43 = vpop.permute.xlu1 %987  ;;  %v5070_v45 = vpop.permute.xlu0 %982 }
 0x1d4   : > { %3725 = vmatprep.mubr.msk.bf16.mxu0 %vm1760_vm1, %v3952_v30  ;;  %3753 = vmatprep.mubr.msk.bf16.mxu1 %vm1760_vm1, %v3953_v50  ;;  %v3971_v30 = vld [vmem:[%s5903_s2 + $0x158] sm:$0xff]   ;;  %v3972_v50 = vld [vmem:[%s5903_s2 + $0x160] sm:$0xff]  }
 0x1db   : > { %3726 = vmatmul.mubr.msk.bf16.gmra.mrb[32].mxu0 %vm1760_vm1, %v3954_v51  ;;  %3754 = vmatmul.mubr.msk.bf16.gmra.mrb[24].mxu1 %vm1760_vm1, %v3955_v55  ;;  %v5080_v51 = vpop.permute.xlu1 %1077  ;;  %v5082_v55 = vpop.permute.xlu0 %1072 }
 0x1dc   : > { %3757 = vmatprep.mubr.msk.bf16.mxu1 %vm1760_vm1, %v3956_v26  ;;  %5920 = vst [vmem:[#allocation14_spill] sm:$0xff] %v5080_v51  ;;  %v3973_v26 = vld [vmem:[%s5903_s2 + $0x168] sm:$0xff]  }
 0x1e3   : > { %3758 = vmatmul.mubr.msk.bf16.gmra.mrb[28].mxu1 %vm1760_vm1, %v3957_v57  ;;  %v3974_v57 = vld [vmem:[%s5903_s2 + $0x170] sm:$0xff]  }
 0x1e4   : > { %3761 = vmatprep.mubr.msk.bf16.mxu1 %vm1760_vm1, %v3958_v62  ;;  %v5090_v62 = vpop.permute.xlu1 %997 }
 0x1eb   : > { %3762 = vmatmul.mubr.msk.bf16.gmra.mrb[32].mxu1 %vm1760_vm1, %v3959_v63  ;;  %v5092_v63 = vpop.permute.xlu0 %992 }
 0x1ec   : > { %3765 = vmatprep.mubr.msk.bf16.mxu1 %vm1760_vm1, %v3960_v6  ;;  %v3975_v6 = vld [vmem:[%s5903_s2 + $0x178] sm:$0xff]  }
 0x1f3   : > { %3766 = vmatmul.mubr.msk.bf16.gmra.mrb[36].mxu1 %vm1760_vm1, %v3961_v38  ;;  %v3976_v38 = vld [vmem:[%s5903_s2 + $0x180] sm:$0xff]  }
 0x1f4   : > { %3769 = vmatprep.mubr.msk.bf16.mxu1 %vm1760_vm1, %v3962_v7  ;;  %v5102_v7 = vpop.permute.xlu1 %1087 }
 0x1f5   : > { %5921 = vst [vmem:[#allocation15_spill] sm:$0xff] %v5102_v7 }
 0x1fb   : > { %3770 = vmatmul.mubr.msk.bf16.gmra.mrb[40].mxu1 %vm1760_vm1, %v3963_v54  ;;  %v5104_v54 = vpop.permute.xlu0 %1082 }
 0x1fc   : > { %3773 = vmatprep.mubr.msk.bf16.mxu1 %vm1760_vm1, %v3964_v10  ;;  %5922 = vst [vmem:[#allocation16_spill] sm:$0xff] %v5104_v54  ;;  %v5108_v10 = vpop.permute.xlu1 %1007 }
 0x203   : > { %3774 = vmatmul.mubr.msk.bf16.gmra.mrb[44].mxu1 %vm1760_vm1, %v3965_v24  ;;  %v5110_v24 = vpop.permute.xlu0 %1002 }
 0x204   : > { %3777 = vmatprep.mubr.msk.bf16.mxu1 %vm1760_vm1, %v3966_v25  ;;  %v3977_v25 = vld [vmem:[%s5903_s2 + $0x188] sm:$0xff]  }
 0x20b   : > { %3778 = vmatmul.mubr.msk.bf16.gmra.mrb[48].mxu1 %vm1760_vm1, %v3967_v29  ;;  %v3978_v29 = vld [vmem:[%s5903_s2 + $0x190] sm:$0xff]  }
 0x20c   : > { %3781 = vmatprep.mubr.msk.bf16.mxu1 %vm1760_vm1, %v3968_v32  ;;  %v5120_v32 = vpop.permute.xlu1 %1097 }
 0x20d   : > { %5923 = vst [vmem:[#allocation17_spill] sm:$0xff] %v5120_v32 }
 0x213   : > { %3782 = vmatmul.mubr.msk.bf16.gmra.mrb[52].mxu1 %vm1760_vm1, %v3969_v39  ;;  %v5122_v39 = vpop.permute.xlu0 %1092 }
 0x214   : > { %3785 = vmatprep.mubr.msk.bf16.mxu1 %vm1760_vm1, %v3970_v44  ;;  %5924 = vst [vmem:[#allocation18_spill] sm:$0xff] %v5122_v39  ;;  %v3979_v44 = vld [vmem:[%s5903_s2 + $0x198] sm:$0xff]   ;;  %v3990_v39 = vld [vmem:[%s5903_s2 + $0x1f0] sm:$0xff]  }
 0x21b   : > { %3786 = vmatmul.mubr.msk.bf16.gmra.mrb[56].mxu1 %vm1760_vm1, %v3971_v30  ;;  %v3980_v30 = vld [vmem:[%s5903_s2 + $0x1a0] sm:$0xff]  }
 0x21c   : > { %3789 = vmatprep.mubr.msk.bf16.mxu1 %vm1760_vm1, %v3972_v50  ;;  %v5130_v50 = vpop.permute.xlu1 %1017 }
 0x223   : > { %3790 = vmatmul.mubr.msk.bf16.gmra.mrb[60].mxu1 %vm1760_vm1, %v3973_v26  ;;  %v5132_v26 = vpop.permute.xlu0 %1012 }
 0x224   : > { %3793 = vmatprep.mubr.msk.bf16.mxu1 %vm1760_vm1, %v3974_v57  ;;  %v3981_v57 = vld [vmem:[%s5903_s2 + $0x1a8] sm:$0xff]  }
 0x22b   : > { %3794 = vmatmul.mubr.msk.bf16.gmra.mrb[64].mxu1 %vm1760_vm1, %v3975_v6  ;;  %v3982_v6 = vld [vmem:[%s5903_s2 + $0x1b0] sm:$0xff]  }
 0x22c   : > { %3797 = vmatprep.mubr.msk.bf16.mxu1 %vm1760_vm1, %v3976_v38  ;;  %v5142_v38 = vpop.permute.xlu1 %1107 }
 0x22d   : > { %5925 = vst [vmem:[#allocation19_spill] sm:$0xff] %v5142_v38 }
 0x233   : > { %3798 = vmatmul.mubr.msk.bf16.gmra.mrb[68].mxu1 %vm1760_vm1, %v3977_v25  ;;  %v5144_v25 = vpop.permute.xlu0 %1102 }
 0x234   : > { %3801 = vmatprep.mubr.msk.bf16.mxu1 %vm1760_vm1, %v3978_v29  ;;  %5926 = vst [vmem:[#allocation20_spill] sm:$0xff] %v5144_v25  ;;  %v5148_v29 = vpop.permute.xlu1 %1027  ;;  %v3986_v25 = vld [vmem:[%s5903_s2 + $0x1d0] sm:$0xff]  }
 0x238   : > { %v5160_v38 = vpop.permute.xlu1 %1117 }
 0x239   : > { %5927 = vst [vmem:[#allocation21_spill] sm:$0xff] %v5160_v38  ;;  %v3988_v38 = vld [vmem:[%s5903_s2 + $0x1e0] sm:$0xff]  }
 0x23b   : > { %3802 = vmatmul.mubr.msk.bf16.gmra.mrb[72].mxu1 %vm1760_vm1, %v3979_v44  ;;  %v5150_v44 = vpop.permute.xlu0 %1022 }
 0x23c   : > { %3805 = vmatprep.mubr.msk.bf16.mxu1 %vm1760_vm1, %v3980_v30  ;;  %v3983_v30 = vld [vmem:[%s5903_s2 + $0x1b8] sm:$0xff]   ;;  %v5170_v7 = vpop.permute.xlu1 %1037 }
 0x243   : > { %3806 = vmatmul.mubr.msk.bf16.gmra.mrb[76].mxu1 %vm1760_vm1, %v3981_v57  ;;  %v5162_v57 = vpop.permute.xlu0 %1112 }
 0x244   : > { %3809 = vmatprep.mubr.msk.bf16.mxu1 %vm1760_vm1, %v3982_v6  ;;  %5928 = vst [vmem:[#allocation22_spill] sm:$0xff] %v5162_v57  ;;  %v3985_v6 = vld [vmem:[%s5903_s2 + $0x1c8] sm:$0xff]   ;;  %v5185_v57 = vpop.permute.xlu1 %1207 }
 0x245   : > { %5929 = vst [vmem:[#allocation23_spill] sm:$0xff] %v5185_v57 }
 0x247   : > { %v5172_v32 = vpop.permute.xlu0 %1032 }
 0x24b   : > { %3810 = vmatmul.mubr.msk.bf16.gmra.mrb[80].mxu1 %vm1760_vm1, %v3983_v30  ;;  %v3987_v30 = vld [vmem:[%s5903_s2 + $0x1d8] sm:$0xff]   ;;  %v5187_v54 = vpop.permute.xlu0 %1202 }
 0x24c   : > { %3813 = vmatprep.mubr.msk.bf16.mxu1 %vm1760_vm1, %v3984_v3  ;;  %v3994_v3 = vld [vmem:[%s5904_s3 + $0x4] ss:$16 sps:$4 sm:$0xff]   ;;  %5930 = vst [vmem:[#allocation24_spill] sm:$0xff] %v5187_v54 }
 0x24d   : > { %2762 = vmatprep.mubr.bf16.mxu0 %v3994_v3  ;;  %v3989_v3 = vld [vmem:[%s5903_s2 + $0x1e8] sm:$0xff]  }
 0x253   : > { %3814 = vmatmul.mubr.msk.bf16.gmra.mrb[84].mxu1 %vm1760_vm1, %v3985_v6  ;;  %v5191_v6 = vpop.permute.xlu1 %1127 }
 0x254   : > { %3817 = vmatprep.mubr.msk.bf16.mxu1 %vm1760_vm1, %v3986_v25  ;;  %5931 = vst [vmem:[#allocation25_spill] sm:$0xff] %v5191_v6  ;;  %v5193_v25 = vpop.permute.xlu0 %1122 }
 0x255   : > { %5932 = vst [vmem:[#allocation26_spill] sm:$0xff] %v5193_v25 }
 0x257   : > { %v5203_v57 = vpop.permute.xlu1 %1217 }
 0x258   : > { %5933 = vst [vmem:[#allocation27_spill] sm:$0xff] %v5203_v57 }
 0x25b   : > { %3818 = vmatmul.mubr.msk.bf16.gmra.mrb[88].mxu1 %vm1760_vm1, %v3987_v30  ;;  %v5205_v30 = vpop.permute.xlu0 %1212  ;;  %v5210_v54 = vpop.permute.xlu1 %1137 }
 0x25c   : > { %3821 = vmatprep.mubr.msk.bf16.mxu1 %vm1760_vm1, %v3988_v38  ;;  %5934 = vst [vmem:[#allocation28_spill] sm:$0xff] %v5205_v30  ;;  %v3991_v38 = vld [vmem:[%s5903_s2 + $0x1f8] sm:$0xff]   ;;  %5935 = vst [vmem:[#allocation29_spill] sm:$0xff] %v5210_v54 }
 0x25f   : > { %v5212_v6 = vpop.permute.xlu0 %1132  ;;  %v5215_v25 = vpop.permute.xlu1 %1227 }
 0x260   : > { %5936 = vst [vmem:[#allocation30_spill] sm:$0xff] %v5212_v6  ;;  %5937 = vst [vmem:[#allocation31_spill] sm:$0xff] %v5215_v25 }
 0x263   : > { %3822 = vmatmul.mubr.msk.bf16.gmra.mrb[92].mxu1 %vm1760_vm1, %v3989_v3  ;;  %v5217_v40 = vpop.permute.xlu0 %1222  ;;  %v5219_v3 = vpop.permute.xlu1 %1147 }
 0x264   : > { %3825 = vmatprep.mubr.msk.bf16.mxu1 %vm1760_vm1, %v3990_v39  ;;  %5938 = vst [vmem:[#allocation32_spill] sm:$0xff] %v5217_v40  ;;  %5939 = vst [vmem:[#allocation33_spill] sm:$0xff] %v5219_v3 }
 0x267   : > { %v5221_v39 = vpop.permute.xlu0 %1142  ;;  %v5223_v57 = vpop.permute.xlu1 %1237 }
 0x268   : > { %5940 = vst [vmem:[#allocation34_spill] sm:$0xff] %v5221_v39  ;;  %5941 = vst [vmem:[#allocation35_spill] sm:$0xff] %v5223_v57 }
 0x26b   : > { %3826 = vmatmul.mubr.msk.bf16.gmra.mrb[96].mxu1 %vm1760_vm1, %v3991_v38  ;;  %v5225_v30 = vpop.permute.xlu0 %1232 }
 0x26c   : > { %5942 = vst [vmem:[#allocation36_spill] sm:$0xff] %v5225_v30 }
 0x27e   : > { %v3703_v21 = vpop.f32.mrb[8].mxu0  ;;  %v3731_v51 = vpop.f32.mrb[0].mxu1 }
 0x27f   : > { %v1996_v54 = vadd.f32 %v3703_v21, %v4724_v1  ;;  %v2108_v6 = vadd.f32 %v3731_v51, %v4870_v16  ;;  %v1987_v37 = vpop.f32.mrb[9].mxu0  ;;  %v2099_v38 = vpop.f32.mrb[1].mxu1 }
 0x280   : > { %v1988_v25 = vadd.f32 %v1987_v37, %v4679_v47  ;;  %v2100_v40 = vadd.f32 %v2099_v38, %v4852_v4  ;;  %v3704_v22 = vpop.f32.mrb[10].mxu0  ;;  %v3732_v3 = vpop.f32.mrb[2].mxu1 }
 0x281   : > { %4026 = vtanh.f32 %v1996_v54  ;;  %v1999_v39 = vadd.f32 %v3704_v22, %v4712_v60  ;;  %v1990_v57 = vpop.f32.mrb[11].mxu0  ;;  %v2102_v33 = vpop.f32.mrb[3].mxu1  ;;  %v2111_v30 = vadd.f32 %v3732_v3, %v4860_v9 }
 0x282   : > { %4028 = vtanh.f32 %v2108_v6  ;;  %v1991_v1 = vadd.f32 %v1990_v57, %v4692_v52  ;;  %v2103_v21 = vadd.f32 %v2102_v33, %v4834_v53  ;;  %v5235_v16 = vpop.permute.xlu1 %1157  ;;  %v5237_v47 = vpop.permute.xlu0 %1152 }
 0x283   : > { %4030 = vtanh.f32 %v1988_v25 }
 0x284   : > { %4032 = vtanh.f32 %v2100_v40 }
 0x285   : > { %4034 = vtanh.f32 %v1999_v39 }
 0x286   : > { %4036 = vtanh.f32 %v2111_v30  ;;  %v3707_v37 = vpop.f32.mrb[12].mxu0  ;;  %v3735_v4 = vpop.f32.mrb[4].mxu1 }
 0x287   : > { %4038 = vtanh.f32 %v1991_v1  ;;  %v2012_v60 = vadd.f32 %v3707_v37, %v4776_v23  ;;  %v2124_v22 = vadd.f32 %v3735_v4, %v5052_v36  ;;  %v2003_v9 = vpop.f32.mrb[13].mxu0  ;;  %v2115_v51 = vpop.f32.mrb[5].mxu1 }
 0x288   : > { %4040 = vtanh.f32 %v2103_v21  ;;  %v2004_v52 = vadd.f32 %v2003_v9, %v4756_v14  ;;  %v2116_v33 = vadd.f32 %v2115_v51, %v5030_v20  ;;  %v3708_v53 = vpop.f32.mrb[14].mxu0  ;;  %v3736_v40 = vpop.f32.mrb[6].mxu1 }
 0x289   : > { %4042 = vtanh.f32 %v2012_v60  ;;  %v2015_v54 = vadd.f32 %v3708_v53, %v4758_v15  ;;  %v2006_v57 = vpop.f32.mrb[15].mxu0  ;;  %v2118_v6 = vpop.f32.mrb[7].mxu1  ;;  %v2127_v25 = vadd.f32 %v3736_v40, %v5050_v35 }
 0x28a   : > { %4044 = vtanh.f32 %v2124_v22  ;;  %v2007_v36 = vadd.f32 %v2006_v57, %v4732_v5  ;;  %v2119_v14 = vadd.f32 %v2118_v6, %v5028_v19  ;;  %v5253_v3 = vpop.permute.xlu1 %1247  ;;  %v5255_v15 = vpop.permute.xlu0 %1242 }
 0x28b   : > { %v5245_v23 = vpop.eup %4026  ;;  %4046 = vtanh.f32 %v2004_v52  ;;  %5943 = vst [vmem:[#allocation37_spill] sm:$0xff] %v5253_v3  ;;  %5944 = vst [vmem:[#allocation38_spill] sm:$0xff] %v5255_v15  ;;  %v5953_v15 = vld [vmem:[#allocation11_spill] sm:$0xff] }
 0x28c   : > { %v5248_v30 = vpop.eup %4028  ;;  %4048 = vtanh.f32 %v2116_v33 }
 0x28d   : > { %v5251_v20 = vpop.eup %4030  ;;  %4050 = vtanh.f32 %v2015_v54 }
 0x28e   : > { %v5257_v39 = vpop.eup %4032  ;;  %4052 = vtanh.f32 %v2127_v25  ;;  %v3711_v35 = vpop.f32.mrb[16].mxu0 }
 0x28f   : > { %v3739_v38 = vpop.f32.mrb[8].mxu1  ;;  %v5259_v1 = vpop.eup %4034  ;;  %4054 = vtanh.f32 %v2007_v36  ;;  %v2028_v5 = vadd.f32 %v3711_v35, %v4842_v59 }
 0x290   : > { %v2140_v21 = vadd.f32 %v3739_v38, %v5092_v63  ;;  %v2019_v19 = vpop.f32.mrb[17].mxu0  ;;  %v2131_v37 = vpop.f32.mrb[9].mxu1  ;;  %4056 = vtanh.f32 %v2119_v14 }
 0x291   : > { %v5263_v4 = vpop.eup %4036  ;;  %v2020_v60 = vadd.f32 %v2019_v19, %v4816_v41  ;;  %v2132_v22 = vadd.f32 %v2131_v37, %v5070_v45  ;;  %v3712_v9 = vpop.f32.mrb[18].mxu0  ;;  %4058 = vtanh.f32 %v2028_v5 }
 0x292   : > { %v3740_v51 = vpop.f32.mrb[10].mxu1  ;;  %v5269_v33 = vpop.eup %4038  ;;  %v2031_v59 = vadd.f32 %v3712_v9, %v4824_v46  ;;  %4060 = vtanh.f32 %v2140_v21 }
 0x293   : > { %v2022_v63 = vpop.f32.mrb[19].mxu0  ;;  %v2134_v53 = vpop.f32.mrb[11].mxu1  ;;  %v2143_v41 = vadd.f32 %v3740_v51, %v5090_v62  ;;  %4062 = vtanh.f32 %v2020_v60 }
 0x294   : > { %v5274_v54 = vpop.eup %4040  ;;  %v2023_v6 = vadd.f32 %v2022_v63, %v4793_v31  ;;  %4064 = vtanh.f32 %v2132_v22  ;;  %v2135_v36 = vadd.f32 %v2134_v53, %v5068_v43  ;;  %v5289_v35 = vpop.permute.xlu1 %1167 }
 0x295   : > { %v5279_v57 = vpop.eup %4042  ;;  %v5291_v62 = vpop.permute.xlu0 %1162  ;;  %4066 = vtanh.f32 %v2031_v59 }
 0x296   : > { %v5284_v25 = vpop.eup %4044  ;;  %4068 = vtanh.f32 %v2143_v41  ;;  %v3715_v5 = vpop.f32.mrb[20].mxu0 }
 0x297   : > { %v5287_v14 = vpop.eup %4046  ;;  %v3743_v31 = vpop.f32.mrb[12].mxu1  ;;  %4070 = vtanh.f32 %v2023_v6  ;;  %v2044_v19 = vadd.f32 %v3715_v5, %v5012_v49 }
 0x298   : > { %v5293_v38 = vpop.eup %4048  ;;  %v2156_v37 = vadd.f32 %v3743_v31, %v5132_v26  ;;  %v2035_v43 = vpop.f32.mrb[21].mxu0  ;;  %4072 = vtanh.f32 %v2135_v36 }
 0x299   : > { %v5295_v21 = vpop.eup %4050  ;;  %v2147_v60 = vpop.f32.mrb[13].mxu1  ;;  %v2036_v9 = vadd.f32 %v2035_v43, %v4865_v12  ;;  %4074 = vtanh.f32 %v2044_v19 }
 0x29a   : > { %v5299_v22 = vpop.eup %4052  ;;  %v2148_v51 = vadd.f32 %v2147_v60, %v5110_v24  ;;  %v3716_v59 = vpop.f32.mrb[22].mxu0  ;;  %4076 = vtanh.f32 %v2156_v37 }
 0x29b   : > { %v3744_v63 = vpop.f32.mrb[14].mxu1  ;;  %v5305_v41 = vpop.eup %4054  ;;  %v2047_v49 = vadd.f32 %v3716_v59, %v5010_v34  ;;  %4078 = vtanh.f32 %v2036_v9 }
 0x29c   : > { %v2038_v26 = vpop.f32.mrb[23].mxu0  ;;  %v2150_v6 = vpop.f32.mrb[15].mxu1  ;;  %v2159_v12 = vadd.f32 %v3744_v63, %v5130_v50  ;;  %4080 = vtanh.f32 %v2148_v51 }
 0x29d   : > { %v5310_v36 = vpop.eup %4056  ;;  %v2039_v19 = vadd.f32 %v2038_v26, %v4850_v2  ;;  %v2151_v60 = vadd.f32 %v2150_v6, %v5108_v10  ;;  %v5325_v37 = vpop.permute.xlu1 %1257  ;;  %4082 = vtanh.f32 %v2047_v49 }
 0x29e   : > { %v5315_v31 = vpop.eup %4058  ;;  %5945 = vst [vmem:[#allocation39_spill] sm:$0xff] %v5325_v37  ;;  %v5327_v50 = vpop.permute.xlu0 %1252  ;;  %4084 = vtanh.f32 %v2159_v12 }
 0x29f   : > { %v5320_v43 = vpop.eup %4060  ;;  %5946 = vst [vmem:[#allocation40_spill] sm:$0xff] %v5327_v50  ;;  %v3719_v9 = vpop.f32.mrb[24].mxu0  ;;  %4086 = vtanh.f32 %v2039_v19 }
 0x2a0   : > { %v5323_v59 = vpop.eup %4062  ;;  %v3747_v2 = vpop.f32.mrb[16].mxu1  ;;  %v2060_v5 = vadd.f32 %v3719_v9, %v4714_v61  ;;  %4088 = vtanh.f32 %v2151_v60 }
 0x2a1   : > { %v5329_v63 = vpop.eup %4064  ;;  %v2172_v51 = vadd.f32 %v3747_v2, %v5172_v32  ;;  %v2051_v10 = vpop.f32.mrb[25].mxu0 }
 0x2a2   : > { %v5331_v26 = vpop.eup %4066  ;;  %v2163_v6 = vpop.f32.mrb[17].mxu1  ;;  %v2052_v40 = vadd.f32 %v2051_v10, %v4666_v42  ;;  %4090 = vtanh.f32 %v2060_v5 }
 0x2a3   : > { %v5335_v34 = vpop.eup %4068  ;;  %v2164_v49 = vadd.f32 %v2163_v6, %v5150_v44  ;;  %v3720_v46 = vpop.f32.mrb[26].mxu0  ;;  %4092 = vtanh.f32 %v2172_v51 }
 0x2a4   : > { %v3748_v12 = vpop.f32.mrb[18].mxu1  ;;  %v5341_v24 = vpop.eup %4070  ;;  %v2063_v61 = vadd.f32 %v3720_v46, %v4702_v56  ;;  %4094 = vtanh.f32 %v2052_v40 }
 0x2a5   : > { %v2054_v32 = vpop.f32.mrb[27].mxu0  ;;  %v2166_v19 = vpop.f32.mrb[19].mxu1  ;;  %v2175_v42 = vadd.f32 %v3748_v12, %v5170_v7  ;;  %4096 = vtanh.f32 %v2164_v49 }
 0x2a6   : > { %v5346_v60 = vpop.eup %4072  ;;  %v2055_v5 = vadd.f32 %v2054_v32, %v4707_v58  ;;  %v2167_v10 = vadd.f32 %v2166_v19, %v5148_v29  ;;  %v5361_v51 = vpop.permute.xlu1 %1177  ;;  %4098 = vtanh.f32 %v2063_v61 }
 0x2a7   : > { %v5351_v2 = vpop.eup %4074  ;;  %v5363_v7 = vpop.permute.xlu0 %1172  ;;  %4100 = vtanh.f32 %v2175_v42 }
 0x2a8   : > { %v5356_v46 = vpop.eup %4076  ;;  %v3723_v40 = vpop.f32.mrb[28].mxu0  ;;  %4102 = vtanh.f32 %v2055_v5 }
 0x2a9   : > { %v5359_v6 = vpop.eup %4078  ;;  %v3751_v58 = vpop.f32.mrb[20].mxu1  ;;  %v2076_v9 = vadd.f32 %v3723_v40, %v4766_v18  ;;  %4104 = vtanh.f32 %v2167_v10 }
 0x2aa   : > { %v5365_v12 = vpop.eup %4080  ;;  %v2188_v49 = vadd.f32 %v3751_v58, %v5042_v28  ;;  %v2067_v29 = vpop.f32.mrb[29].mxu0 }
 0x2ab   : > { %v5367_v32 = vpop.eup %4082  ;;  %v2179_v19 = vpop.f32.mrb[21].mxu1  ;;  %v2068_v53 = vadd.f32 %v2067_v29, %v4740_v8  ;;  %4106 = vtanh.f32 %v2076_v9 }
 0x2ac   : > { %v5371_v56 = vpop.eup %4084  ;;  %v2180_v61 = vadd.f32 %v2179_v19, %v5024_v17  ;;  %v3724_v44 = vpop.f32.mrb[30].mxu0  ;;  %4108 = vtanh.f32 %v2188_v49 }
 0x2ad   : > { %v3752_v42 = vpop.f32.mrb[22].mxu1  ;;  %v5377_v45 = vpop.eup %4086  ;;  %v2079_v18 = vadd.f32 %v3724_v44, %v4748_v11  ;;  %4110 = vtanh.f32 %v2068_v53 }
 0x2ae   : > { %v2070_v28 = vpop.f32.mrb[31].mxu0  ;;  %v2182_v5 = vpop.f32.mrb[23].mxu1  ;;  %v2191_v8 = vadd.f32 %v3752_v42, %v5040_v27  ;;  %4112 = vtanh.f32 %v2180_v61 }
 0x2af   : > { %v5382_v10 = vpop.eup %4088  ;;  %v2071_v29 = vadd.f32 %v2070_v28, %v4722_v0  ;;  %v5392_v44 = vpop.permute.xlu0 %1262  ;;  %v2183_v19 = vadd.f32 %v2182_v5, %v5022_v13  ;;  %4114 = vtanh.f32 %v2079_v18  ;;  %v5951_v13 = vld [vmem:[#allocation10_spill] sm:$0xff] }
 0x2b0   : > { %v4091_v58 = vpop.eup %4090  ;;  %5948 = vst [vmem:[#allocation42_spill] sm:$0xff] %v5392_v44  ;;  %v5395_v40 = vpop.permute.xlu1 %1267  ;;  %4116 = vtanh.f32 %v2191_v8 }
 0x2b1   : > { %v5390_v9 = vpop.eup %4092  ;;  %5949 = vst [vmem:[#allocation43_spill] sm:$0xff] %v5395_v40  ;;  %v3727_v53 = vpop.f32.mrb[32].mxu0  ;;  %4118 = vtanh.f32 %v2071_v29  ;;  %v5952_v40 = vld [vmem:[#allocation13_spill] sm:$0xff] }
 0x2b2   : > { %5947 = vst [vmem:[#allocation41_spill] sm:$0xff] %v5390_v9  ;;  %v4095_v49 = vpop.eup %4094  ;;  %v3755_v42 = vpop.f32.mrb[24].mxu1  ;;  %v2092_v28 = vadd.f32 %v3727_v53, %v4826_v48  ;;  %4120 = vtanh.f32 %v2183_v19 }
 0x2b3   : > { %v5397_v27 = vpop.eup %4096  ;;  %v2204_v11 = vadd.f32 %v3755_v42, %v5082_v55  ;;  %v2083_v52 = vpop.f32.mrb[33].mxu0 }
 0x2b4   : > { %v4099_v0 = vpop.eup %4098  ;;  %v2195_v17 = vpop.f32.mrb[25].mxu1  ;;  %v2084_v5 = vadd.f32 %v2083_v52, %v5951_v13  ;;  %4122 = vtanh.f32 %v2092_v28  ;;  %v5954_v52 = vld [vmem:[#allocation14_spill] sm:$0xff]  ;;  %v5956_v13 = vld [vmem:[#allocation12_spill] sm:$0xff] }
 0x2b5   : > { %v5401_v61 = vpop.eup %4100  ;;  %v2196_v18 = vadd.f32 %v2195_v17, %v5952_v40  ;;  %v3728_v44 = vpop.f32.mrb[34].mxu0  ;;  %v2643_v8 = vpack.c.bf16 %v4099_v0, %v4091_v58  ;;  %4124 = vtanh.f32 %v2204_v11  ;;  %v5955_v58 = vld [vmem:[#allocation9_spill] sm:$0xff] }
 0x2b6   : > { %5950 = vst [vmem:[#allocation44_spill] sm:$0xff] %v5401_v61  ;;  %v3756_v3 = vpop.f32.mrb[26].mxu1  ;;  %v4103_v37 = vpop.eup %4102  ;;  %v2095_v29 = vadd.f32 %v3728_v44, %v5953_v15  ;;  %4126 = vtanh.f32 %v2084_v5 }
 0x2b7   : > { %v2086_v50 = vpop.f32.mrb[35].mxu0  ;;  %v2198_v48 = vpop.f32.mrb[27].mxu1  ;;  %v2207_v19 = vadd.f32 %v3756_v3, %v5954_v52  ;;  %v2642_v40 = vpack.c.bf16 %v4103_v37, %v4095_v49  ;;  %4128 = vtanh.f32 %v2196_v18  ;;  %v5957_v3 = vpack.c.bf16 %v5269_v33, %v5251_v20  ;;  %v5958_v49 = vld [vmem:[#allocation18_spill] sm:$0xff] }
 0x2b8   : > { %v5408_v53 = vpop.eup %4104  ;;  %v5410_v42 = vpop.permute.xlu0 %1182  ;;  %v2087_v0 = vadd.f32 %v2086_v50, %v5955_v58  ;;  %v2199_v55 = vadd.f32 %v2198_v48, %v5956_v13  ;;  %4130 = vtanh.f32 %v2095_v29  ;;  %v5960_v29 = vld [vmem:[#allocation16_spill] sm:$0xff] }
 0x2b9   : > { %v4107_v17 = vpop.eup %4106  ;;  %v5418_v28 = vpop.permute.xlu1 %1187  ;;  %3565 = vmatprep.subr.bf16.mxu0 %v2642_v40  ;;  %4132 = vtanh.f32 %v2207_v19  ;;  %v5962_v19 = vld [vmem:[#allocation17_spill] sm:$0xff] }
 0x2ba   : > { %v5416_v44 = vpop.eup %4108  ;;  %3566 = vmatpush3.bf16.msra.mxu0 %v5957_v3  ;;  %v3759_v50 = vpop.f32.mrb[28].mxu1  ;;  %4134 = vtanh.f32 %v2087_v0 }
 0x2bb   : > { %v4111_v9 = vpop.eup %4110  ;;  %3567 = vmatprep.subr.bf16.mxu0 %v2643_v8  ;;  %v2220_v5 = vadd.f32 %v3759_v50, %v5958_v49  ;;  %v2211_v52 = vpop.f32.mrb[29].mxu1  ;;  %4136 = vtanh.f32 %v2199_v55  ;;  %v5961_v8 = vpack.c.bf16 %v5259_v1, %v5245_v23  ;;  %v5964_v55 = vld [vmem:[#allocation15_spill] sm:$0xff] }
 0x2bc   : > { %v5424_v37 = vpop.eup %4112  ;;  %v5429_v48 = vpop.permute.xlu0 %1272  ;;  %v2212_v40 = vadd.f32 %v2211_v52, %v5960_v29  ;;  %v5965_v29 = vpack.c.bf16 %v5305_v41, %v5287_v14  ;;  %v5968_v41 = vpack.c.bf16 %v5295_v21, %v5279_v57 }
 0x2bd   : > { %v4115_v11 = vpop.eup %4114  ;;  %5959 = vst [vmem:[#allocation10_spill] sm:$0xff] %v5429_v48  ;;  %v3760_v58 = vpop.f32.mrb[30].mxu1  ;;  %4138 = vtanh.f32 %v2220_v5 }
 0x2be   : > { %v5427_v18 = vpop.eup %4116  ;;  %v2645_v20 = vpack.c.bf16 %v4115_v11, %v4107_v17  ;;  %3568 = vmatpush3.bf16.msra.mxu0 %v5961_v8  ;;  %v2223_v0 = vadd.f32 %v3760_v58, %v5962_v19  ;;  %v2214_v13 = vpop.f32.mrb[31].mxu1  ;;  %4140 = vtanh.f32 %v2212_v40  ;;  %v5966_v8 = vld [vmem:[#allocation22_spill] sm:$0xff] }
 0x2bf   : > { %v4119_v33 = vpop.eup %4118  ;;  %v5440_v49 = vpop.permute.xlu1 %1277  ;;  %v2215_v52 = vadd.f32 %v2214_v13, %v5964_v55 }
 0x2c0   : > { %v5438_v50 = vpop.eup %4120  ;;  %5963 = vst [vmem:[#allocation13_spill] sm:$0xff] %v5440_v49  ;;  %v2644_v17 = vpack.c.bf16 %v4119_v33, %v4111_v9  ;;  %4142 = vtanh.f32 %v2223_v0  ;;  %v5452_v40 = vpop.permute.xlu0 %1192  ;;  %v5970_v49 = vld [vmem:[#allocation19_spill] sm:$0xff] }
 0x2c1   : > { %v4123_v11 = vpop.eup %4122  ;;  %4144 = vtanh.f32 %v2215_v52  ;;  %v3763_v9 = vpop.f32.mrb[32].mxu1  ;;  %v5967_v52 = vld [vmem:[#allocation20_spill] sm:$0xff] }
 0x2c2   : > { %v5445_v1 = vpop.eup %4124  ;;  %3569 = vmatprep.subr.bf16.mxu0 %v2644_v17  ;;  %v2236_v19 = vadd.f32 %v3763_v9, %v5966_v8  ;;  %v2227_v0 = vpop.f32.mrb[33].mxu1  ;;  %v5979_v9 = vld [vmem:[#allocation25_spill] sm:$0xff] }
 0x2c3   : > { %v4127_v5 = vpop.eup %4126  ;;  %3570 = vmatpush3.bf16.msra.mxu0 %v5965_v29  ;;  %v5457_v55 = vpop.permute.xlu1 %1197  ;;  %v2228_v17 = vadd.f32 %v2227_v0, %v5967_v52 }
 0x2c4   : > { %v5450_v58 = vpop.eup %4128  ;;  %3571 = vmatprep.subr.bf16.mxu0 %v2645_v20  ;;  %v3764_v15 = vpop.f32.mrb[34].mxu1  ;;  %4146 = vtanh.f32 %v2236_v19  ;;  %v5969_v20 = vld [vmem:[#allocation21_spill] sm:$0xff] }
 0x2c5   : > { %v4131_v33 = vpop.eup %4130  ;;  %v2239_v29 = vadd.f32 %v3764_v15, %v5969_v20  ;;  %v2230_v23 = vpop.f32.mrb[35].mxu1  ;;  %4148 = vtanh.f32 %v2228_v17  ;;  %v5974_v17 = vld [vmem:[#allocation30_spill] sm:$0xff]  ;;  %v4269_v20 = vmov 2  }
 0x2c6   : > { %v5455_v13 = vpop.eup %4132  ;;  %v2647_v3 = vpack.c.bf16 %v4131_v33, %v4123_v11  ;;  %v2231_v48 = vadd.f32 %v2230_v23, %v5970_v49  ;;  %v5475_v21 = vpop.permute.xlu0 %1362  ;;  %v5972_v33 = vpack.c.bf16 %v5341_v24, %v5323_v59  ;;  %3915 = vset.pattern.permute.xlu1 %v4269_v20  ;;  %3914 = vset.pattern.permute.xlu0 %v4269_v20  ;;  %v5494_v24 = vld [vmem:[%s5906_s5 + $0x8] sm:$0xff]  ;;  %v5499_v59 = vld [vmem:[%s5906_s5] sm:$0xff] }
 0x2c7   : > { %v4135_v14 = vpop.eup %4134  ;;  %3572 = vmatpush3.bf16.msra.mxu0 %v5968_v41  ;;  %4150 = vtanh.f32 %v2239_v29  ;;  %5971 = vst [vmem:[#allocation11_spill] sm:$0xff] %v5475_v21  ;;  %v5484_v23 = vpop.permute.xlu1 %1367  ;;  %2677 = vperm.xlu1 %3915, %v5494_v24  }
 0x2c8   : > { %v5466_v8 = vpop.eup %4136  ;;  %v2646_v0 = vpack.c.bf16 %v4135_v14, %v4127_v5  ;;  %4152 = vtanh.f32 %v2231_v48  ;;  %5973 = vst [vmem:[#allocation14_spill] sm:$0xff] %v5484_v23  ;;  %v3767_v5 = vpop.f32.mrb[36].mxu1  ;;  %2672 = vperm.xlu0 %3914, %v5499_v59   ;;  %v5978_v48 = vpack.c.bf16 %v5274_v54, %v5257_v39  ;;  %v5980_v39 = vpack.c.bf16 %v5377_v45, %v5359_v6  ;;  %v5982_v6 = vld [vmem:[#allocation34_spill] sm:$0xff] }
 0x2c9   : > { %v5469_v52 = vpop.eup %4138  ;;  %v2252_v14 = vadd.f32 %v3767_v5, %v5974_v17  ;;  %v2243_v41 = vpop.f32.mrb[37].mxu1  ;;  %v5977_v5 = vld [vmem:[#allocation29_spill] sm:$0xff] }
 0x2ca   : > { %v5473_v57 = vpop.eup %4140  ;;  %3573 = vmatprep.subr.bf16.mxu0 %v2646_v0  ;;  %v3768_v0 = vpop.f32.mrb[38].mxu1 }
 0x2cb   : > { %v5477_v15 = vpop.eup %4142  ;;  %3574 = vmatpush3.bf16.msra.mxu0 %v5972_v33  ;;  %v5976_v33 = vpack.c.bf16 %v5331_v26, %v5315_v31  ;;  %v2255_v17 = vadd.f32 %v3768_v0, %v5977_v5  ;;  %v2246_v20 = vpop.f32.mrb[39].mxu1  ;;  %v2564_v11 = vmax.f32 %v2252_v14, 0.0  ;;  %v5981_v14 = vpack.c.bf16 %v5263_v4, %v5248_v30  ;;  %v3992_v30 = vld [vmem:[%s5904_s3] ss:$16 sps:$4 sm:$0xff]  }
 0x2cc   : > { %v5482_v49 = vpop.eup %4144  ;;  %3575 = vmatprep.subr.bf16.mxu0 %v2647_v3  ;;  %v5975_v3 = vld [vmem:[#allocation26_spill] sm:$0xff]  ;;  %v5508_v19 = vpop.permute.xlu0 %1282  ;;  %v5983_v4 = vpack.c.bf16 %v5367_v32, %v5351_v2 }
 0x2cd   : > { %v2244_v29 = vadd.f32 %v2243_v41, %v5975_v3  ;;  %v2247_v41 = vadd.f32 %v2246_v20, %v5979_v9  ;;  %v2565_v23 = vmax.f32 %v2255_v17, 0.0  ;;  %v5518_v61 = vpop.permute.xlu1 %1287 }
 0x2ce   : > { %v5514_v3 = vpop.eup %4146 }
 0x2cf   : > { %3576 = vmatpush3.bf16.msra.mxu0 %v5976_v33  ;;  %v5516_v21 = vpop.eup %4148  ;;  %v2562_v31 = vmax.f32 %v2244_v29, 0.0  ;;  %v2563_v26 = vmax.f32 %v2247_v41, 0.0  ;;  %v5522_v33 = vpack.c.bf16 %v2565_v23, %v2564_v11 }
 0x2d0   : > { %3577 = vmatprep.subr.bf16.mxu0 %v5978_v48  ;;  %v3771_v48 = vpop.f32.mrb[40].mxu1  ;;  %v5539_v45 = vpop.permute.xlu0 %1372 }
 0x2d1   : > { %v5520_v0 = vpop.eup %4150  ;;  %v5529_v9 = vpack.c.bf16 %v2563_v26, %v2562_v31  ;;  %v2268_v5 = vadd.f32 %v3771_v48, %v5237_v47  ;;  %v2259_v11 = vpop.f32.mrb[41].mxu1  ;;  %v3995_v31 = vld [vmem:[%s5904_s3 + $0x24] ss:$16 sps:$4 sm:$0xff]  }
 0x2d2   : > { %v5527_v54 = vpop.eup %4152  ;;  %v2260_v17 = vadd.f32 %v2259_v11, %v5982_v6  ;;  %v3772_v20 = vpop.f32.mrb[42].mxu1 }
 0x2d3   : > { %3578 = vmatpush3.bf16.msra.mxu0 %v5980_v39  ;;  %v2664_v23 = vpack.c.bf16 %v5527_v54, %v5516_v21  ;;  %v2271_v41 = vadd.f32 %v3772_v20, %v5235_v16  ;;  %v2262_v47 = vpop.f32.mrb[43].mxu1  ;;  %v5552_v26 = vpop.permute.xlu1 %1377  ;;  %v5984_v39 = vpack.c.bf16 %v5438_v50, %v5424_v37  ;;  %v2568_v11 = vmax.f32 %v2268_v5, 0.0  ;;  %v6003_v54 = vld [vmem:[#allocation36_spill] sm:$0xff] }
 0x2d4   : > { %3579 = vmatprep.subr.bf16.mxu0 %v5981_v14  ;;  %v5985_v14 = vld [vmem:[#allocation33_spill] sm:$0xff]  ;;  %v2566_v29 = vmax.f32 %v2260_v17, 0.0  ;;  %v5986_v16 = vpack.c.bf16 %v5310_v36, %v5293_v38  ;;  %v5563_v20 = vpop.permute.xlu0 %1292  ;;  %v5987_v37 = vpack.c.bf16 %v5427_v18, %v5416_v44  ;;  %v2668_v36 = vld [vmem:[%s5906_s5 + $0x10] sm:$0xff]  ;;  %v2669_v44 = vld [vmem:[%s5906_s5 + $0x18] sm:$0xff] }
 0x2d5   : > { %v2263_v48 = vadd.f32 %v2262_v47, %v5985_v14  ;;  %v2569_v6 = vmax.f32 %v2271_v41, 0.0  ;;  %v3997_v38 = vld [vmem:[%s5904_s3 + $0x20] ss:$16 sps:$4 sm:$0xff]   ;;  %2682 = vperm.xlu1 %3915, %v2668_v36   ;;  %2687 = vperm.xlu0 %3914, %v2669_v44  }
 0x2d6   : > { %v3775_v50 = vpop.f32.mrb[44].mxu1 }
 0x2d7   : > { %3580 = vmatpush3.bf16.msra.mxu0 %v5983_v4  ;;  %v2567_v2 = vmax.f32 %v2263_v48, 0.0  ;;  %v5558_v32 = vpack.c.bf16 %v2569_v6, %v2568_v11  ;;  %v2284_v5 = vadd.f32 %v3775_v50, %v5363_v7  ;;  %v2275_v17 = vpop.f32.mrb[45].mxu1  ;;  %v5988_v7 = vpack.c.bf16 %v5299_v22, %v5284_v25 }
 0x2d8   : > { %3593 = vmatprep.subr.bf16.mxu0 %v5984_v39  ;;  %v2276_v41 = vadd.f32 %v2275_v17, %v5291_v62  ;;  %v3776_v47 = vpop.f32.mrb[46].mxu1  ;;  %v5594_v11 = vpop.permute.xlu0 %1382  ;;  %v5990_v6 = vpack.c.bf16 %v5346_v60, %v5329_v63 }
 0x2d9   : > { %v5565_v4 = vpack.c.bf16 %v2567_v2, %v2566_v29  ;;  %v2287_v18 = vadd.f32 %v3776_v47, %v5361_v51  ;;  %v2278_v62 = vpop.f32.mrb[47].mxu1  ;;  %v4000_v29 = vld [vmem:[%s5904_s3 + $0xc] ss:$16 sps:$4 sm:$0xff]   ;;  %v2572_v14 = vmax.f32 %v2284_v5, 0.0  ;;  %v5992_v5 = vpack.c.bf16 %v5335_v34, %v5320_v43 }
 0x2da   : > { %2763 = vmatmul.mubr.bf16.vlgmr.msra.gmra.mrb[36].mxu0 %v3992_v30  ;;  %v5571_v30 = vpop.permute.xlu1 %1297  ;;  %v2279_v39 = vadd.f32 %v2278_v62, %v5289_v35  ;;  %v2570_v25 = vmax.f32 %v2276_v41, 0.0  ;;  %v5991_v35 = vpack.c.bf16 %v5455_v13, %v5445_v1  ;;  %v5994_v43 = vpack.c.bf16 %v5382_v10, %v5365_v12  ;;  %v5997_v62 = vld [vmem:[#allocation24_spill] sm:$0xff]  ;;  %v5999_v10 = vld [vmem:[#allocation27_spill] sm:$0xff] }
 0x2db   : > { %3594 = vmatpush3.bf16.msra.mxu0 %v5986_v16  ;;  %2770 = vmatprep.mubr.bf16.mxu0 %v3995_v31  ;;  %v5989_v31 = vpack.c.bf16 %v5466_v8, %v5450_v58  ;;  %v2573_v48 = vmax.f32 %v2287_v18, 0.0  ;;  %v4270_v16 = vmov 3   ;;  %v5998_v12 = vpack.c.bf16 %v5371_v56, %v5356_v46 }
 0x2dc   : > { %3595 = vmatprep.subr.bf16.mxu0 %v5987_v37  ;;  %v2571_v22 = vmax.f32 %v2279_v39, 0.0  ;;  %3916 = vset.pattern.permute.xlu1 %v4270_v16  ;;  %v5616_v17 = vpop.permute.xlu0 %1302  ;;  %v6001_v56 = vpack.c.bf16 %v5408_v53, %v5397_v27  ;;  %v3998_v27 = vld [vmem:[%s5904_s3 + $0x8] ss:$16 sps:$4 sm:$0xff]  }
 0x2dd   : > { %v5596_v51 = vpack.c.bf16 %v2573_v48, %v2572_v14  ;;  %3917 = vset.pattern.permute.xlu0 %v4270_v16  ;;  %2874 = vperm.xlu1 %3916, %v5499_v59   ;;  %v6002_v16 = vpack.c.bf16 %v5520_v0, %v5514_v3  ;;  %v6005_v53 = vld [vmem:[#allocation44_spill] sm:$0xff] }
 0x2de   : > { %v5601_v2 = vpop.permute.xlu1 %1387  ;;  %v5603_v58 = vpack.c.bf16 %v2571_v22, %v2570_v25  ;;  %v3779_v8 = vpop.f32.mrb[48].mxu1  ;;  %2878 = vperm.xlu0 %3917, %v5494_v24  }
 0x2df   : > { %3596 = vmatpush3.bf16.msra.mxu0 %v5988_v7  ;;  %v2300_v37 = vadd.f32 %v3779_v8, %v5452_v40  ;;  %v2291_v50 = vpop.f32.mrb[49].mxu1  ;;  %v5993_v40 = vpack.c.bf16 %v5482_v49, %v5473_v57  ;;  %v5995_v57 = vpack.c.bf16 %v5477_v15, %v5469_v52  ;;  %v5996_v49 = vld [vmem:[#allocation28_spill] sm:$0xff]  ;;  %v6000_v52 = vld [vmem:[#allocation23_spill] sm:$0xff] }
 0x2e0   : > { %3597 = vmatprep.subr.bf16.mxu0 %v5989_v31  ;;  %v2292_v63 = vadd.f32 %v2291_v50, %v5410_v42  ;;  %v3780_v60 = vpop.f32.mrb[50].mxu1  ;;  %v5635_v18 = vpop.permute.xlu0 %1392 }
 0x2e1   : > { %v2303_v1 = vadd.f32 %v3780_v60, %v5457_v55  ;;  %v2294_v13 = vpop.f32.mrb[51].mxu1  ;;  %v2576_v41 = vmax.f32 %v2300_v37, 0.0  ;;  %2882 = vperm.xlu1 %3916, %v2668_v36  }
 0x2e2   : > { %2771 = vmatmul.mubr.bf16.gmra.mrb[40].mxu0 %v3997_v38  ;;  %v2295_v59 = vadd.f32 %v2294_v13, %v5418_v28  ;;  %v5622_v47 = vpop.permute.xlu1 %1307  ;;  %v2574_v24 = vmax.f32 %v2292_v63, 0.0  ;;  %v6004_v63 = vld [vmem:[#allocation32_spill] sm:$0xff] }
 0x2e3   : > { %3598 = vmatpush3.bf16.msra.mxu0 %v5990_v6  ;;  %2811 = vmatprep.mubr.bf16.mxu0 %v4000_v29  ;;  %v2577_v42 = vmax.f32 %v2303_v1, 0.0  ;;  %v6006_v1 = vld [vmem:[#allocation41_spill] sm:$0xff] }
 0x2e4   : > { %3599 = vmatprep.subr.bf16.mxu0 %v5991_v35  ;;  %v2575_v38 = vmax.f32 %v2295_v59, 0.0  ;;  %v5651_v46 = vpop.permute.xlu0 %1312  ;;  %v6007_v13 = vpack.c.bf16 %v6005_v53, %v6006_v1  ;;  %v4001_v59 = vld [vmem:[%s5904_s3 + $0x2c] ss:$16 sps:$4 sm:$0xff]  }
 0x2e5   : > { %v5624_v34 = vpack.c.bf16 %v2577_v42, %v2576_v41  ;;  %2886 = vperm.xlu1 %3916, %v2669_v44   ;;  %v6009_v41 = vld [vmem:[#allocation31_spill] sm:$0xff]  ;;  %v6015_v53 = vld [vmem:[#allocation42_spill] sm:$0xff] }
 0x2e6   : > { %v5629_v55 = vpack.c.bf16 %v2575_v38, %v2574_v24  ;;  %v3783_v28 = vpop.f32.mrb[52].mxu1  ;;  %v5642_v48 = vpop.permute.xlu1 %1397 }
 0x2e7   : > { %3600 = vmatpush3.bf16.msra.mxu0 %v5992_v5  ;;  %v2316_v7 = vadd.f32 %v3783_v28, %v5996_v49  ;;  %v2307_v36 = vpop.f32.mrb[53].mxu1 }
 0x2e8   : > { %3601 = vmatprep.subr.bf16.mxu0 %v5993_v40  ;;  %v2308_v29 = vadd.f32 %v2307_v36, %v5997_v62  ;;  %v3784_v31 = vpop.f32.mrb[54].mxu1  ;;  %v6008_v40 = vld [vmem:[#allocation35_spill] sm:$0xff] }
 0x2e9   : > { %v2319_v39 = vadd.f32 %v3784_v31, %v5999_v10  ;;  %v2310_v14 = vpop.f32.mrb[55].mxu1  ;;  %v2580_v44 = vmax.f32 %v2316_v7, 0.0  ;;  %v6011_v10 = vld [vmem:[#allocation38_spill] sm:$0xff] }
 0x2ea   : > { %v2311_v15 = vadd.f32 %v2310_v14, %v6000_v52  ;;  %v2578_v22 = vmax.f32 %v2308_v29, 0.0  ;;  %v5657_v50 = vpop.permute.xlu1 %1317  ;;  %v6010_v29 = vld [vmem:[#allocation40_spill] sm:$0xff] }
 0x2eb   : > { %3602 = vmatpush3.bf16.msra.mxu0 %v5994_v43  ;;  %v2581_v25 = vmax.f32 %v2319_v39, 0.0  ;;  %v5671_v43 = vpop.permute.xlu0 %1402  ;;  %v4003_v52 = vld [vmem:[%s5904_s3 + $0x28] ss:$16 sps:$4 sm:$0xff]  }
 0x2ec   : > { %3603 = vmatprep.subr.bf16.mxu0 %v5995_v57  ;;  %v2579_v6 = vmax.f32 %v2311_v15, 0.0  ;;  %v6012_v15 = vld [vmem:[#allocation39_spill] sm:$0xff] }
 0x2ed   : > { %v2850_v35 = vpack.c.bf16 %v2581_v25, %v2580_v44  ;;  %v4006_v25 = vld [vmem:[%s5904_s3 + $0x44] ss:$16 sps:$4 sm:$0xff]  }
 0x2ee   : > { %v2849_v8 = vpack.c.bf16 %v2579_v6, %v2578_v22  ;;  %v3787_v21 = vpop.f32.mrb[56].mxu1  ;;  %v5674_v7 = vpop.permute.xlu1 %1407  ;;  %v6013_v6 = vld [vmem:[#allocation37_spill] sm:$0xff] }
 0x2ef   : > { %3604 = vmatpush3.bf16.msra.mxu0 %v5998_v12  ;;  %v2323_v37 = vpop.f32.mrb[57].mxu1  ;;  %v5686_v22 = vpop.permute.xlu0 %1322 }
 0x2f0   : > { %3605 = vmatprep.subr.bf16.mxu0 %v2664_v23  ;;  %v2332_v23 = vadd.f32 %v3787_v21, %v6003_v54  ;;  %v2324_v60 = vadd.f32 %v2323_v37, %v6004_v63  ;;  %v3788_v5 = vpop.f32.mrb[58].mxu1  ;;  %v6014_v63 = vld [vmem:[#allocation10_spill] sm:$0xff] }
 0x2f1   : > { %v2335_v3 = vadd.f32 %v3788_v5, %v6008_v40  ;;  %v2326_v0 = vpop.f32.mrb[59].mxu1  ;;  %v6016_v40 = vld [vmem:[#allocation13_spill] sm:$0xff] }
 0x2f2   : > { %v2327_v42 = vadd.f32 %v2326_v0, %v6009_v41  ;;  %v2584_v24 = vmax.f32 %v2332_v23, 0.0  ;;  %v2582_v57 = vmax.f32 %v2324_v60, 0.0 }
 0x2f3   : > { %3606 = vmatpush3.bf16.msra.mxu0 %v6001_v56  ;;  %v2585_v38 = vmax.f32 %v2335_v3, 0.0 }
 0x2f4   : > { %3607 = vmatprep.subr.bf16.mxu0 %v6002_v16  ;;  %v2583_v28 = vmax.f32 %v2327_v42, 0.0  ;;  %v5689_v16 = vpop.permute.xlu1 %1327 }
 0x2f5   : > { %v2852_v49 = vpack.c.bf16 %v2585_v38, %v2584_v24 }
 0x2f6   : > { %v2851_v36 = vpack.c.bf16 %v2583_v28, %v2582_v57  ;;  %v3791_v62 = vpop.f32.mrb[60].mxu1 }
 0x2f7   : > { %3608 = vmatpush3.bf16.msra.mxu0 %v6007_v13  ;;  %v2348_v31 = vadd.f32 %v3791_v62, %v6010_v29  ;;  %v2339_v12 = vpop.f32.mrb[61].mxu1 }
 0x2f8   : > { %3621 = vmatprep.subr.bf16.mxu0 %v2849_v8  ;;  %v2340_v39 = vadd.f32 %v2339_v12, %v6011_v10  ;;  %v3792_v14 = vpop.f32.mrb[62].mxu1 }
 0x2f9   : > { %v2342_v44 = vpop.f32.mrb[63].mxu1  ;;  %v2588_v56 = vmax.f32 %v2348_v31, 0.0 }
 0x2fa   : > { %2812 = vmatmul.mubr.bf16.vlgmr.msra.gmra.mrb[44].mxu0 %v3998_v27  ;;  %v2586_v21 = vmax.f32 %v2340_v39, 0.0  ;;  %v5693_v27 = vpop.permute.xlu0 %1412 }
 0x2fb   : > { %3622 = vmatpush3.bf16.msra.mxu0 %v5529_v9  ;;  %2819 = vmatprep.mubr.bf16.mxu0 %v4001_v59  ;;  %v2351_v9 = vadd.f32 %v3792_v14, %v6012_v15  ;;  %v5698_v59 = vpop.permute.xlu1 %1417 }
 0x2fc   : > { %3623 = vmatprep.subr.bf16.mxu0 %v2850_v35  ;;  %v2343_v35 = vadd.f32 %v2342_v44, %v6013_v6 }
 0x2fd   : > { %v2589_v8 = vmax.f32 %v2351_v9, 0.0 }
 0x2fe   : > { %v2587_v54 = vmax.f32 %v2343_v35, 0.0  ;;  %v3795_v37 = vpop.f32.mrb[64].mxu1 }
 0x2ff   : > { %3624 = vmatpush3.bf16.msra.mxu0 %v5522_v33  ;;  %v2854_v33 = vpack.c.bf16 %v2589_v8, %v2588_v56  ;;  %v2364_v60 = vadd.f32 %v3795_v37, %v6014_v63  ;;  %v2355_v5 = vpop.f32.mrb[65].mxu1  ;;  %v1338_v31 = vpop.permute.xlu1 %1337  ;;  %v4004_v8 = vld [vmem:[%s5904_s3 + $0x40] ss:$16 sps:$4 sm:$0xff]  }
 0x300   : > { %3625 = vmatprep.subr.bf16.mxu0 %v2851_v36  ;;  %v2853_v23 = vpack.c.bf16 %v2587_v54, %v2586_v21  ;;  %v2356_v1 = vadd.f32 %v2355_v5, %v6015_v53  ;;  %v3796_v13 = vpop.f32.mrb[66].mxu1  ;;  %v4007_v54 = vld [vmem:[%s5904_s3 + $0x64] ss:$16 sps:$4 sm:$0xff]  }
 0x301   : > { %v2367_v3 = vadd.f32 %v3796_v13, %v6016_v40  ;;  %v2358_v0 = vpop.f32.mrb[67].mxu1  ;;  %v2592_v42 = vmax.f32 %v2364_v60, 0.0 }
 0x302   : > { %2820 = vmatmul.mubr.bf16.gmra.mrb[48].mxu0 %v4003_v52  ;;  %v2590_v38 = vmax.f32 %v2356_v1, 0.0 }
 0x303   : > { %3626 = vmatpush3.bf16.msra.mxu0 %v5565_v4  ;;  %2961 = vmatprep.mubr.bf16.mxu0 %v4006_v25  ;;  %v6017_v4 = vld [vmem:[#allocation43_spill] sm:$0xff]  ;;  %v2593_v24 = vmax.f32 %v2367_v3, 0.0 }
 0x304   : > { %3627 = vmatprep.subr.bf16.mxu0 %v2852_v49  ;;  %v2359_v41 = vadd.f32 %v2358_v0, %v6017_v4  ;;  %v1333_v49 = vpop.permute.xlu0 %1332 }
 0x305   : > { %v2856_v28 = vpack.c.bf16 %v2593_v24, %v2592_v42 }
 0x306   : > { %v2591_v57 = vmax.f32 %v2359_v41, 0.0  ;;  %v3799_v62 = vpop.f32.mrb[68].mxu1  ;;  %v4012_v41 = vld [vmem:[%s5904_s3 + $0x4c] ss:$16 sps:$4 sm:$0xff]  }
 0x307   : > { %3628 = vmatpush3.bf16.msra.mxu0 %v5558_v32  ;;  %v2380_v32 = vadd.f32 %v3799_v62, %v5563_v20  ;;  %v2371_v29 = vpop.f32.mrb[69].mxu1 }
 0x308   : > { %3629 = vmatprep.subr.bf16.mxu0 %v2853_v23  ;;  %v2855_v36 = vpack.c.bf16 %v2591_v57, %v2590_v38  ;;  %v2372_v12 = vadd.f32 %v2371_v29, %v5508_v19  ;;  %v3800_v10 = vpop.f32.mrb[70].mxu1  ;;  %v5707_v9 = vpop.permute.xlu0 %1422 }
 0x309   : > { %v2383_v39 = vadd.f32 %v3800_v10, %v5571_v30  ;;  %v2374_v14 = vpop.f32.mrb[71].mxu1  ;;  %v5712_v19 = vpop.permute.xlu1 %1427 }
 0x30a   : > { %v2375_v52 = vadd.f32 %v2374_v14, %v5518_v61  ;;  %v2594_v44 = vmax.f32 %v2372_v12, 0.0 }
 0x30b   : > { %3630 = vmatpush3.bf16.msra.mxu0 %v5603_v58  ;;  %v2596_v58 = vmax.f32 %v2380_v32, 0.0  ;;  %v2597_v15 = vmax.f32 %v2383_v39, 0.0 }
 0x30c   : > { %3631 = vmatprep.subr.bf16.mxu0 %v2854_v33  ;;  %v2595_v25 = vmax.f32 %v2375_v52, 0.0  ;;  %v1343_v33 = vpop.permute.xlu0 %1342 }
 0x30d   : > { %v5709_v20 = vpack.c.bf16 %v2597_v15, %v2596_v58 }
 0x30e   : > { %v5714_v6 = vpack.c.bf16 %v2595_v25, %v2594_v44  ;;  %v3803_v30 = vpop.f32.mrb[72].mxu1 }
 0x30f   : > { %3632 = vmatpush3.bf16.msra.mxu0 %v5596_v51  ;;  %v2396_v51 = vadd.f32 %v3803_v30, %v5651_v46  ;;  %v2387_v35 = vpop.f32.mrb[73].mxu1 }
 0x310   : > { %3633 = vmatprep.subr.bf16.mxu0 %v2855_v36  ;;  %v2388_v61 = vadd.f32 %v2387_v35, %v5616_v17  ;;  %v3804_v56 = vpop.f32.mrb[74].mxu1  ;;  %v1348_v17 = vpop.permute.xlu1 %1347 }
 0x311   : > { %v2390_v21 = vpop.f32.mrb[75].mxu1  ;;  %v2600_v23 = vmax.f32 %v2396_v51, 0.0  ;;  %v5731_v13 = vpop.permute.xlu0 %1432 }
 0x312   : > { %v2391_v46 = vadd.f32 %v2390_v21, %v5622_v47  ;;  %v2598_v63 = vmax.f32 %v2388_v61, 0.0  ;;  %v4009_v47 = vld [vmem:[%s5904_s3 + $0x60] ss:$16 sps:$4 sm:$0xff]  }
 0x313   : > { %3634 = vmatpush3.bf16.msra.mxu0 %v5629_v55  ;;  %v2399_v55 = vadd.f32 %v3804_v56, %v5657_v50 }
 0x314   : > { %3635 = vmatprep.subr.bf16.mxu0 %v2856_v28  ;;  %v2599_v60 = vmax.f32 %v2391_v46, 0.0  ;;  %v5740_v42 = vpop.permute.xlu1 %1437  ;;  %v6019_v46 = vld [vmem:[#allocation14_spill] sm:$0xff] }
 0x315   : > { %v2601_v37 = vmax.f32 %v2399_v55, 0.0  ;;  %v1353_v36 = vpop.permute.xlu0 %1352 }
 0x316   : > { %v3807_v50 = vpop.f32.mrb[76].mxu1 }
 0x317   : > { %3636 = vmatpush3.bf16.msra.mxu0 %v5624_v34  ;;  %v5727_v5 = vpack.c.bf16 %v2601_v37, %v2600_v23  ;;  %v5729_v34 = vpack.c.bf16 %v2599_v60, %v2598_v63  ;;  %v2412_v53 = vadd.f32 %v3807_v50, %v1333_v49  ;;  %v2403_v1 = vpop.f32.mrb[77].mxu1 }
 0x318   : > { %v2404_v40 = vadd.f32 %v2403_v1, %v5686_v22  ;;  %v3808_v3 = vpop.f32.mrb[78].mxu1  ;;  %v1358_v12 = vpop.permute.xlu1 %1357 }
 0x319   : > { %v2415_v0 = vadd.f32 %v3808_v3, %v1338_v31  ;;  %v2406_v4 = vpop.f32.mrb[79].mxu1  ;;  %v2604_v38 = vmax.f32 %v2412_v53, 0.0 }
 0x31a   : > { %2962 = vmatmul.mubr.bf16.vlgmr.msra.gmra.mrb[52].mxu0 %v4004_v8  ;;  %v2407_v24 = vadd.f32 %v2406_v4, %v5689_v16  ;;  %v2602_v28 = vmax.f32 %v2404_v40, 0.0  ;;  %v6018_v8 = vld [vmem:[#allocation11_spill] sm:$0xff] }
 0x31b   : > { %2969 = vmatprep.mubr.bf16.mxu0 %v4007_v54  ;;  %v2605_v57 = vmax.f32 %v2415_v0, 0.0 }
 0x31c   : > { %v2603_v49 = vmax.f32 %v2407_v24, 0.0 }
 0x31d   : > { %v5743_v22 = vpack.c.bf16 %v2605_v57, %v2604_v38 }
 0x31e   : > { %v5745_v62 = vpack.c.bf16 %v2603_v49, %v2602_v28  ;;  %v3811_v32 = vpop.f32.mrb[80].mxu1 }
 0x31f   : > { %v2428_v29 = vadd.f32 %v3811_v32, %v1353_v36  ;;  %v2419_v31 = vpop.f32.mrb[81].mxu1 }
 0x320   : > { %v2420_v10 = vadd.f32 %v2419_v31, %v1343_v33  ;;  %v3812_v39 = vpop.f32.mrb[82].mxu1 }
 0x321   : > { %v2431_v14 = vadd.f32 %v3812_v39, %v1358_v12  ;;  %v2422_v52 = vpop.f32.mrb[83].mxu1  ;;  %v2608_v58 = vmax.f32 %v2428_v29, 0.0 }
 0x322   : > { %2970 = vmatmul.mubr.bf16.gmra.mrb[56].mxu0 %v4009_v47  ;;  %v2423_v16 = vadd.f32 %v2422_v52, %v1348_v17  ;;  %v2606_v44 = vmax.f32 %v2420_v10, 0.0 }
 0x323   : > { %3010 = vmatprep.mubr.bf16.mxu0 %v4012_v41  ;;  %v2609_v15 = vmax.f32 %v2431_v14, 0.0 }
 0x324   : > { %v2607_v25 = vmax.f32 %v2423_v16, 0.0 }
 0x325   : > { %v5747_v30 = vpack.c.bf16 %v2609_v15, %v2608_v58 }
 0x326   : > { %v5749_v51 = vpack.c.bf16 %v2607_v25, %v2606_v44  ;;  %v3815_v35 = vpop.f32.mrb[84].mxu1 }
 0x327   : > { %v2444_v61 = vadd.f32 %v3815_v35, %v5539_v45  ;;  %v2435_v56 = vpop.f32.mrb[85].mxu1 }
 0x328   : > { %v2436_v55 = vadd.f32 %v2435_v56, %v6018_v8  ;;  %v3816_v21 = vpop.f32.mrb[86].mxu1 }
 0x329   : > { %v2447_v54 = vadd.f32 %v3816_v21, %v5552_v26  ;;  %v2438_v33 = vpop.f32.mrb[87].mxu1  ;;  %v2612_v37 = vmax.f32 %v2444_v61, 0.0 }
 0x32a   : > { %v2439_v23 = vadd.f32 %v2438_v33, %v6019_v46  ;;  %v2610_v63 = vmax.f32 %v2436_v55, 0.0 }
 0x32b   : > { %v2613_v17 = vmax.f32 %v2447_v54, 0.0 }
 0x32c   : > { %v2611_v60 = vmax.f32 %v2439_v23, 0.0 }
 0x32d   : > { %v2866_v50 = vpack.c.bf16 %v2613_v17, %v2612_v37  ;;  %v4273_v37 = vmov 4   ;;  %v4166_v17 = vld [vmem:[%s5906_s5 + $0x8] sm:$0xff] }
 0x32e   : > { %v2865_v53 = vpack.c.bf16 %v2611_v60, %v2610_v63  ;;  %v3819_v1 = vpop.f32.mrb[88].mxu1  ;;  %3919 = vset.pattern.permute.xlu1 %v4273_v37  ;;  %3918 = vset.pattern.permute.xlu0 %v4273_v37  ;;  %v4167_v63 = vld [vmem:[%s5906_s5] sm:$0xff]  ;;  %v331_v60 = vsub.f32 1.0, %v4166_v17 }
 0x32f   : > { %v2460_v40 = vadd.f32 %v3819_v1, %v5635_v18  ;;  %v2451_v3 = vpop.f32.mrb[89].mxu1  ;;  %3040 = vperm.xlu1 %3919, %v4166_v17   ;;  %3036 = vperm.xlu0 %3918, %v4167_v63  }
 0x330   : > { %v2452_v45 = vadd.f32 %v2451_v3, %v5594_v11  ;;  %v3820_v47 = vpop.f32.mrb[90].mxu1  ;;  %3649 = vmatprep.subr.bf16.mxu0 %v2865_v53  ;;  %v6020_v53 = vmov 6  }
 0x331   : > { %v2463_v0 = vadd.f32 %v3820_v47, %v5642_v48  ;;  %v2454_v26 = vpop.f32.mrb[91].mxu1  ;;  %3650 = vmatpush3.bf16.msra.mxu0 %v5714_v6  ;;  %v2616_v41 = vmax.f32 %v2460_v40, 0.0  ;;  %v4274_v40 = vmov 5  }
 0x332   : > { %v2455_v4 = vadd.f32 %v2454_v26, %v5601_v2  ;;  %3651 = vmatprep.subr.bf16.mxu0 %v2866_v50  ;;  %v2614_v38 = vmax.f32 %v2452_v45, 0.0  ;;  %v330_v50 = vsub.f32 1.0, %v4167_v63 }
 0x333   : > { %v2617_v24 = vmax.f32 %v2463_v0, 0.0  ;;  %3920 = vset.pattern.permute.xlu1 %v6020_v53  ;;  %3921 = vset.pattern.permute.xlu0 %v6020_v53 }
 0x334   : > { %v2615_v57 = vmax.f32 %v2455_v4, 0.0  ;;  %3100 = vperm.xlu0 %3921, %v331_v60   ;;  %3095 = vperm.xlu1 %3920, %v330_v50  }
 0x335   : > { %v2868_v28 = vpack.c.bf16 %v2617_v24, %v2616_v41  ;;  %3652 = vmatpush3.bf16.msra.mxu0 %v5709_v20 }
 0x336   : > { %v2867_v18 = vpack.c.bf16 %v2615_v57, %v2614_v38  ;;  %v3823_v49 = vpop.f32.mrb[92].mxu1 }
 0x337   : > { %v2476_v11 = vadd.f32 %v3823_v49, %v5693_v27  ;;  %v2467_v36 = vpop.f32.mrb[93].mxu1 }
 0x338   : > { %v2468_v48 = vadd.f32 %v2467_v36, %v5671_v43  ;;  %v3824_v32 = vpop.f32.mrb[94].mxu1  ;;  %3653 = vmatprep.subr.bf16.mxu0 %v2867_v18  ;;  %3922 = vset.pattern.permute.xlu1 %v4274_v40 }
 0x339   : > { %v2479_v6 = vadd.f32 %v3824_v32, %v5698_v59  ;;  %v2470_v2 = vpop.f32.mrb[95].mxu1  ;;  %3654 = vmatpush3.bf16.msra.mxu0 %v5729_v34  ;;  %v2620_v31 = vmax.f32 %v2476_v11, 0.0  ;;  %3923 = vset.pattern.permute.xlu0 %v4274_v40 }
 0x33a   : > { %v2471_v29 = vadd.f32 %v2470_v2, %v5674_v7  ;;  %3655 = vmatprep.subr.bf16.mxu0 %v2868_v28  ;;  %v2618_v20 = vmax.f32 %v2468_v48, 0.0  ;;  %3111 = vperm.xlu1 %3922, %v4167_v63  }
 0x33b   : > { %v2621_v12 = vmax.f32 %v2479_v6, 0.0 }
 0x33c   : > { %v2619_v10 = vmax.f32 %v2471_v29, 0.0 }
 0x33d   : > { %v2870_v39 = vpack.c.bf16 %v2621_v12, %v2620_v31  ;;  %3656 = vmatpush3.bf16.msra.mxu0 %v5727_v5 }
 0x33e   : > { %v2869_v27 = vpack.c.bf16 %v2619_v10, %v2618_v20  ;;  %v3827_v14 = vpop.f32.mrb[96].mxu1  ;;  %3115 = vperm.xlu1 %3922, %v4166_v17  }
 0x33f   : > { %v2492_v43 = vadd.f32 %v3827_v14, %v5731_v13  ;;  %v2483_v52 = vpop.f32.mrb[97].mxu1 }
 0x340   : > { %v2484_v59 = vadd.f32 %v2483_v52, %v5707_v9  ;;  %v3828_v16 = vpop.f32.mrb[98].mxu1  ;;  %3657 = vmatprep.subr.bf16.mxu0 %v2869_v27  ;;  %v4010_v9 = vld [vmem:[%s5904_s3 + $0x48] ss:$16 sps:$4 sm:$0xff]  }
 0x341   : > { %v2495_v34 = vadd.f32 %v3828_v16, %v5740_v42  ;;  %v2486_v7 = vpop.f32.mrb[99].mxu1  ;;  %3658 = vmatpush3.bf16.msra.mxu0 %v5745_v62  ;;  %v2624_v15 = vmax.f32 %v2492_v43, 0.0  ;;  %v4271_v42 = vmov 0.0  }
 0x342   : > { %v2487_v58 = vadd.f32 %v2486_v7, %v5712_v19  ;;  %3659 = vmatprep.subr.bf16.mxu0 %v2870_v39  ;;  %v2622_v5 = vmax.f32 %v2484_v59, 0.0  ;;  %v4013_v19 = vld [vmem:[%s5904_s3 + $0x6c] ss:$16 sps:$4 sm:$0xff]   ;;  %v4016_v59 = vld [vmem:[%s5905_s4] sm:$0xff]  }
 0x343   : > { %v2625_v44 = vmax.f32 %v2495_v34, 0.0 }
 0x344   : > { %v2623_v25 = vmax.f32 %v2487_v58, 0.0 }
 0x345   : > { %v2872_v35 = vpack.c.bf16 %v2625_v44, %v2624_v15  ;;  %3660 = vmatpush3.bf16.msra.mxu0 %v5743_v22  ;;  %v4015_v22 = vld [vmem:[%s5904_s3 + $0x68] ss:$16 sps:$4 sm:$0xff]  }
 0x346   : > { %v2871_v13 = vpack.c.bf16 %v2623_v25, %v2622_v5  ;;  %v2678_v3 = vpop.permute.xlu1 %2677 }
 0x347   : > { %v2673_v1 = vpop.permute.xlu0 %2672 }
 0x348   : > { %3661 = vmatprep.subr.bf16.mxu0 %v2871_v13 }
 0x349   : > { %3662 = vmatpush3.bf16.msra.mxu0 %v5749_v51 }
 0x34a   : > { %3663 = vmatprep.subr.bf16.mxu0 %v2872_v35 }
 0x34d   : > { %3664 = vmatpush3.bf16.msra.mxu0 %v5747_v30 }
 0x34e   : > { %3829 = vmatprep.subr.bf16.mxu0 %v4271_v42 }
 0x350   : > { %3011 = vmatmul.mubr.bf16.vlgmr.msra.gmra.mrb[60].mxu0 %v4010_v9 }
 0x351   : > { %3018 = vmatprep.mubr.bf16.mxu0 %v4013_v19 }
 0x354   : > { %v2683_v28 = vpop.permute.xlu1 %2682  ;;  %v2688_v49 = vpop.permute.xlu0 %2687 }
 0x358   : > { %3019 = vmatmul.mubr.bf16.gmra.mrb[64].mxu0 %v4015_v22 }
 0x359   : > { %3833 = vmatprep.mubr.msk.bf16.mxu0 %vm4272_vm2, %v4271_v42 }
 0x35c   : > { %v2875_v22 = vpop.permute.xlu1 %2874 }
 0x3ad   : > { %v3581_v62 = vpop.f32.mrb[36].mxu0 }
 0x3ae   : > { %v3582_v30 = vpop.f32.mrb[37].mxu0 }
 0x3af   : > { %v3583_v51 = vadd.f32 %v3582_v30, %v3581_v62  ;;  %v3584_v61 = vpop.f32.mrb[38].mxu0  ;;  %v2879_v30 = vpop.permute.xlu0 %2878 }
 0x3b0   : > { %v3585_v56 = vpop.f32.mrb[39].mxu0 }
 0x3b1   : > { %v3586_v8 = vadd.f32 %v3585_v56, %v3584_v61  ;;  %v2765_v47 = vadd.f32 %v3583_v51, %v2673_v1 }
 0x3b3   : > { %v2768_v4 = vadd.f32 %v3586_v8, %v2678_v3 }
 0x3b5   : > { %v3587_v55 = vpop.f32.mrb[40].mxu0 }
 0x3b6   : > { %v3588_v21 = vpop.f32.mrb[41].mxu0 }
 0x3b7   : > { %v3589_v54 = vadd.f32 %v3588_v21, %v3587_v55  ;;  %v3590_v33 = vpop.f32.mrb[42].mxu0  ;;  %v2883_v55 = vpop.permute.xlu1 %2882 }
 0x3b8   : > { %v3591_v46 = vpop.f32.mrb[43].mxu0 }
 0x3b9   : > { %v3592_v23 = vadd.f32 %v3591_v46, %v3590_v33  ;;  %v2773_v36 = vadd.f32 %v3589_v54, %v2683_v28 }
 0x3bb   : > { %v2776_v2 = vadd.f32 %v3592_v23, %v2688_v49  ;;  %v2887_v60 = vpop.permute.xlu1 %2886 }
 0x3bf   : > { %v3041_v28 = vpop.permute.xlu1 %3040 }
 0x3cd   : > { %v3609_v45 = vpop.f32.mrb[44].mxu0 }
 0x3ce   : > { %v3610_v0 = vpop.f32.mrb[45].mxu0 }
 0x3cf   : > { %v3611_v26 = vadd.f32 %v3610_v0, %v3609_v45  ;;  %v3612_v41 = vpop.f32.mrb[46].mxu0 }
 0x3d0   : > { %v3613_v24 = vpop.f32.mrb[47].mxu0 }
 0x3d1   : > { %v2814_v38 = vadd.f32 %v3611_v26, %v2765_v47  ;;  %v3614_v57 = vadd.f32 %v3613_v24, %v3612_v41 }
 0x3d3   : > { %4154 = vtanh.f32 %v2814_v38  ;;  %v2817_v18 = vadd.f32 %v3614_v57, %v2768_v4  ;;  %v4017_v57 = vld [vmem:[%s5905_s4 + $0x8] sm:$0xff]  }
 0x3d5   : > { %4156 = vtanh.f32 %v2817_v18  ;;  %v3615_v11 = vpop.f32.mrb[48].mxu0  ;;  %v3037_v18 = vpop.permute.xlu0 %3036 }
 0x3d6   : > { %v3616_v48 = vpop.f32.mrb[49].mxu0 }
 0x3d7   : > { %v3617_v32 = vadd.f32 %v3616_v48, %v3615_v11  ;;  %v3618_v6 = vpop.f32.mrb[50].mxu0  ;;  %v5808_v11 = vpop.permute.xlu1 %3095 }
 0x3d8   : > { %v3619_v29 = vpop.f32.mrb[51].mxu0 }
 0x3d9   : > { %v2822_v31 = vadd.f32 %v3617_v32, %v2773_v36  ;;  %v3620_v12 = vadd.f32 %v3619_v29, %v3618_v6  ;;  %v5810_v32 = vpop.permute.xlu0 %3100 }
 0x3db   : > { %4158 = vtanh.f32 %v2822_v31  ;;  %v2825_v20 = vadd.f32 %v3620_v12, %v2776_v2 }
 0x3dd   : > { %v4155_v10 = vpop.eup %4154  ;;  %4160 = vtanh.f32 %v2825_v20 }
 0x3df   : > { %v4157_v39 = vpop.eup %4156 }
 0x3e0   : > { %v3033_v27 = vpack.c.bf16 %v4157_v39, %v4155_v10 }
 0x3e2   : > { %3830 = vmatpush3.bf16.msra.mxu0 %v3033_v27 }
 0x3e3   : > { %3831 = vmatprep.subr.bf16.mxu0 %v4271_v42 }
 0x3e5   : > { %v4159_v14 = vpop.eup %4158 }
 0x3e7   : > { %v4161_v43 = vpop.eup %4160 }
 0x3e8   : > { %v3034_v52 = vpack.c.bf16 %v4161_v43, %v4159_v14 }
 0x3ea   : > { %3832 = vmatpush3.bf16.msra.mxu0 %v3034_v52 }
 0x3eb   : > { %3837 = vmatprep.subr.bf16.mxu0 %v4271_v42 }
 0x3ed   : > { %v3637_v16 = vpop.f32.mrb[52].mxu0  ;;  %3834 = vmatmul.mubr.msk.bf16.vlgmr.msra.gmra.mrb[68].mxu0 %vm3048_vm3, %v4016_v59 }
 0x3ee   : > { %v3638_v34 = vpop.f32.mrb[53].mxu0  ;;  %3841 = vmatprep.mubr.msk.bf16.mxu0 %vm4272_vm2, %v4271_v42 }
 0x3ef   : > { %v3639_v7 = vadd.f32 %v3638_v34, %v3637_v16  ;;  %v3640_v58 = vpop.f32.mrb[54].mxu0 }
 0x3f0   : > { %v3641_v15 = vpop.f32.mrb[55].mxu0 }
 0x3f1   : > { %v3642_v44 = vadd.f32 %v3641_v15, %v3640_v58  ;;  %v2964_v61 = vadd.f32 %v3639_v7, %v2875_v22 }
 0x3f3   : > { %v2967_v54 = vadd.f32 %v3642_v44, %v2879_v30 }
 0x3f5   : > { %v3643_v5 = vpop.f32.mrb[56].mxu0 }
 0x3f6   : > { %v3644_v25 = vpop.f32.mrb[57].mxu0 }
 0x3f7   : > { %v3645_v35 = vadd.f32 %v3644_v25, %v3643_v5  ;;  %v3646_v13 = vpop.f32.mrb[58].mxu0 }
 0x3f8   : > { %v3647_v9 = vpop.f32.mrb[59].mxu0 }
 0x3f9   : > { %v3648_v19 = vadd.f32 %v3647_v9, %v3646_v13  ;;  %v2972_v53 = vadd.f32 %v3645_v35, %v2883_v55 }
 0x3fb   : > { %v2975_v47 = vadd.f32 %v3648_v19, %v2887_v60 }
 0x423   : > { %v3665_v62 = vpop.f32.mrb[60].mxu0 }
 0x424   : > { %v3666_v51 = vpop.f32.mrb[61].mxu0 }
 0x425   : > { %v3667_v56 = vadd.f32 %v3666_v51, %v3665_v62  ;;  %v3668_v8 = vpop.f32.mrb[62].mxu0 }
 0x426   : > { %v3669_v21 = vpop.f32.mrb[63].mxu0 }
 0x427   : > { %v3013_v33 = vadd.f32 %v3667_v56, %v2964_v61  ;;  %v3670_v46 = vadd.f32 %v3669_v21, %v3668_v8 }
 0x429   : > { %v3016_v23 = vadd.f32 %v3670_v46, %v2967_v54  ;;  %v3027_v37 = vmax.f32 %v3013_v33, 0.0 }
 0x42b   : > { %v3028_v17 = vmax.f32 %v3016_v23, 0.0  ;;  %v3671_v63 = vpop.f32.mrb[64].mxu0 }
 0x42c   : > { %v3672_v50 = vpop.f32.mrb[65].mxu0 }
 0x42d   : > { %v3108_v1 = vpack.c.bf16 %v3028_v17, %v3027_v37  ;;  %v3673_v40 = vadd.f32 %v3672_v50, %v3671_v63  ;;  %v3674_v3 = vpop.f32.mrb[66].mxu0 }
 0x42e   : > { %v3675_v45 = vpop.f32.mrb[67].mxu0 }
 0x42f   : > { %v3021_v0 = vadd.f32 %v3673_v40, %v2972_v53  ;;  %v3676_v26 = vadd.f32 %v3675_v45, %v3674_v3  ;;  %3838 = vmatpush3.bf16.msra.mxu0 %v3108_v1 }
 0x430   : > { %3839 = vmatprep.subr.bf16.mxu0 %v4271_v42 }
 0x431   : > { %v3024_v4 = vadd.f32 %v3676_v26, %v2975_v47  ;;  %v3029_v41 = vmax.f32 %v3021_v0, 0.0 }
 0x433   : > { %v3030_v24 = vmax.f32 %v3024_v4, 0.0 }
 0x435   : > { %v3109_v38 = vpack.c.bf16 %v3030_v24, %v3029_v41 }
 0x437   : > { %3840 = vmatpush3.bf16.msra.mxu0 %v3109_v38 }
 0x43a   : > { %3842 = vmatmul.mubr.msk.bf16.vlgmr.msra.gmra.mrb[72].mxu0 %vm3048_vm3, %v4017_v57 }
 0x4c0   : > { %v3086_v49 = vpop.f32.mrb[68].mxu0 }
 0x4c1   : > { %v3087_v36 = vadd.f32 %v3086_v49, %v3037_v18  ;;  %v3835_v42 = vpop.f32.mrb[69].mxu0 }
 0x4c2   : > { %v3089_v48 = vpop.f32.mrb[70].mxu0 }
 0x4c3   : > { %v3090_v6 = vadd.f32 %v3089_v48, %v3041_v28  ;;  %v3103_v2 = vmul.f32 %v5808_v11, %v3087_v36  ;;  %v3836_v29 = vpop.f32.mrb[71].mxu0 }
 0x4c5   : > { %v3104_v31 = vmul.f32 %v5810_v32, %v3090_v6 }
 0x4c7   : > { %v3179_v12 = vadd.f32 %v3104_v31, %v3103_v2 }
 0x4c9   : > { %v3180_v20 = vrot.slane %v3179_v12, 4 }
 0x4cb   : > { %v3181_v10 = vadd.f32 %v3180_v20, %v3179_v12 }
 0x4cd   : > { %v3182_v39 = vrot.slane %v3181_v10, 2 }
 0x4cf   : > { %v3183_v27 = vadd.f32 %v3182_v39, %v3181_v10 }
 0x4d1   : > { %v3184_v14 = vrot.slane %v3183_v27, 1 }
 0x4d3   : > { %v3185_v43 = vadd.f32 %v3184_v14, %v3183_v27 }
 0x4d5   : > { %3186 = vst [vmem:[%s324_s29] sm:$0x1] %v3185_v43 }
 0x4d6   : > { %4183 = shalt.err (!%p4180_p5)
}
 0x4d7   : > { %s4184_s23 = scalar_lea.hbm %s5819_s15, 16  ;;  %s4188_s13 = scalar_lea.hbm %s5908_s7, 32 }
 0x4d8   : > { %p4185_p7 = scmp.ne.s32.totalorder %s5819_s15, %s4184_s23  ;;  %p4189_p12 = scmp.lt.u32.totalorder %s5819_s15, %s5908_s7 }
 0x4d9   : > { %p4190_p13 = scmp.lt.u32.totalorder %s4188_s13, %s4184_s23  ;;  %p4192_p1 = scmp.lt.u32.totalorder %s4184_s23, %s5819_s15 }
 0x4da   : > { %p4186_p10 = pnand %p4185_p7, %p4359_p6 }
 0x4db   : > { %p4191_p0 = por %p4190_p13, %p4189_p12 }
 0x4dc   : > { %p4187_p11 = pneg %p4186_p10 }
 0x4dd   : > { %p4193_p2 = por %p4192_p1, %p4191_p0 }
 0x4df   : > { %p4194_p3 = pnand %p4193_p2, %p4187_p11 }
 0x4e1   : > { %4197 = shalt.err (!%p4194_p3)
}
 0x4e2   : > { %3854 = dma.vmem_to_hbm [thread:$0]  (%p4359_p6), %s5821_s8, 16, %s5819_s15, %s3193_s17   ;;  %v3169_v52 = vmul.f32 1.442695, %v3103_v2  ;;  %v3171_v59 = vmul.f32 1.442695, %v3104_v31  ;;  %v3112_v16 = vpop.permute.xlu1 %3111  ;;  %v4168_v15 = vld [vmem:[%s4541_s14] sm:$0xff] }
 0x4e3   : > { %s318_s18 = scalar_lea.vmem [#allocation3], %s3319_s19  ;;  %s3488_s8 = sshll.u32 %s4341_s28, 7  ;;  %v4169_v51 = vld [vmem:[%s4541_s14 + $0x8] sm:$0xff] }
 0x4e4   : > { %4162 = vpow2.f32 %v3169_v52  ;;  %s3204_s22 = sshll.u32 %s318_s18, 4  ;;  %s5857_s17 = scalar_lea.hbm %s5907_s6, %s3488_s8  ;;  %s5850_s22 = int_to_ptr.vmem [resolvable:$true] %s3204_s22 }
 0x4e5   : > { %4164 = vpow2.f32 %v3171_v59  ;;  %s3188_s23 = scalar_lea.sflag [#allocation4], %s4521_s16  ;;  %s4198_s28 = scalar_lea.vmem %s5850_s22, 256 }
 0x4e6   : > { %v3116_v35 = vpop.permute.xlu1 %3115  ;;  %p4199_p4 = scmp.ne.s32.totalorder %s5850_s22, %s4198_s28  ;;  %s4276_s29 = smov [#allocation3]  }
 0x4e7   : > { %s4202_s9 = sshll.u32 %s4276_s29, 4  ;;  %s4203_s9 = int_to_ptr.vmem [resolvable:$false] %s4202_s9 }
 0x4e8   : > { %p4200_p5 = pnand %p4199_p4, %p4359_p6  ;;  %s4204_s13 = scalar_lea.vmem %s4203_s9, 512 }
 0x4e9   : > { %p4205_p10 = scmp.lt.s32.totalorder %s5850_s22, %s4203_s9  ;;  %p4206_p11 = scmp.lt.s32.totalorder %s4204_s13, %s4198_s28 }
 0x4ea   : > { %p4201_p7 = pneg %p4200_p5 }
 0x4eb   : > { %p4207_p12 = por %p4206_p11, %p4205_p10 }
 0x4ed   : > { %p4208_p13 = pnand %p4207_p12, %p4201_p7 }
 0x4ee   : > { %v4163_v34 = vpop.eup %4162 }
 0x4ef   : > { %v3173_v44 = vmul.f32 %v4168_v15, %v4163_v34  ;;  %v4165_v25 = vpop.eup %4164 }
 0x4f0   : > { %v3174_v61 = vmul.f32 %v4169_v51, %v4165_v25 }
 0x50d   : > { %v3160_v7 = vpop.f32.mrb[72].mxu0 }
 0x50e   : > { %v3161_v58 = vadd.f32 %v3160_v7, %v3112_v16  ;;  %v3843_v5 = vpop.f32.mrb[73].mxu0 }
 0x50f   : > { %v3163_v13 = vpop.f32.mrb[74].mxu0 }
 0x510   : > { %v3167_v9 = vmul.f32 %v3161_v58, %v5808_v11  ;;  %v3164_v19 = vadd.f32 %v3163_v13, %v3116_v35  ;;  %v3844_v22 = vpop.f32.mrb[75].mxu0 }
 0x512   : > { %v3175_v62 = vadd.f32 %v3173_v44, %v3167_v9  ;;  %v3168_v30 = vmul.f32 %v3164_v19, %v5810_v32 }
 0x514   : > { %3177 = vst [vmem:[%s318_s18] sm:$0xff] %v3175_v62  ;;  %v3176_v56 = vadd.f32 %v3174_v61, %v3168_v30 }
 0x516   : > { %3178 = vst [vmem:[%s318_s18 + $0x8] sm:$0xff] %v3176_v56 }
 0x517   : > { %4211 = shalt.err (!%p4208_p13)
}
 0x518   : > { %s4212_s14 = scalar_lea.hbm %s5857_s17, 256  ;;  %s4216_s18 = scalar_lea.hbm %s5907_s6, 512 }
 0x519   : > { %p4213_p0 = scmp.ne.s32.totalorder %s5857_s17, %s4212_s14  ;;  %p4217_p3 = scmp.lt.u32.totalorder %s5857_s17, %s5907_s6 }
 0x51a   : > { %p4218_p4 = scmp.lt.u32.totalorder %s4216_s18, %s4212_s14  ;;  %p4220_p7 = scmp.lt.u32.totalorder %s4212_s14, %s5857_s17 }
 0x51b   : > { %p4214_p1 = pnand %p4213_p0, %p4359_p6 }
 0x51c   : > { %p4219_p5 = por %p4218_p4, %p4217_p3 }
 0x51d   : > { %p4215_p2 = pneg %p4214_p1 }
 0x51e   : > { %p4221_p10 = por %p4220_p7, %p4219_p5 }
 0x520   : > { %p4222_p11 = pnand %p4221_p10, %p4215_p2 }
 0x522   : > { %4225 = shalt.err (!%p4222_p11)
}
 0x523   : > { %s4277_s15 = smov 128   ;;  %s4278_s28 = smov 256  }
 0x524   : > { %s4279_s29 = smov 8  }
 0x525   : > { %3853 = dma.vmem_to_hbm [thread:$0]  (%p4359_p6), %s5850_s22, 256, %s5857_s17, %s3188_s23, %s4277_s15, %s4278_s28, %s4279_s29  }
 0x526 PF: > { %s3232_s9 = sand.u32 1, %s4252_s24   ;;  %p3858_p12 = pnand %p3315_p9, %p4363_p8 }
 0x527   : > { %s3233_s13 = scalar_lea.sflag [#allocation4], %s3232_s9 }
 0x528   : > { %4243 = dma.done.wait (!%p3858_p12), %s3233_s13, 256  }
 0x529   : > { %4245 = vsyncadd (!%p3858_p12), %s3233_s13, 4294967040  ;;  %s3242_s14 = scalar_lea.sflag [#allocation6], %s3232_s9 }
 0x52a   : > { %4247 = dma.done.wait (!%p3858_p12), %s3242_s14, 16  }
 0x52b   : > { %4249 = vsyncadd (!%p3858_p12), %s3242_s14, 4294967280  ;;  %p21_p6 = scmp.ge.s32.totalorder %s4345_s30, 4   ;;  %s6021_s24 = smov %s4256_s25 }
 0x52c   : > { %s6022_s25 = smov %s4260_s26  ;;  %s6023_s26 = smov %s4357_s10 }
 0x52d   : > { %s6024_s27 = smov %s4345_s30  ;;  %23 = sbr.rel (!%p21_p6) target bundleno = 5 (0x5), region = 141 }
 0x534   :  { %3246 = vsyncpa [#allocation4], 1 }
 0x535   :  { %3248 = vsyncpa [#allocation4 + $0x1], 1 }
 0x536   :  { %3249 = vsyncpa [#allocation6], 1 }
 0x537   :  { %3251 = vsyncpa [#allocation6 + $0x1], 1 }

</bundles_post_ra>
